<compile_context>
chip_gen: v7x
topology: tpu7x:2x2x1
jax: 0.10.0
libtpu: 0.0.40
codegen_flags: <defaults>
</compile_context>

<pallas_src>
import functools

import jax
import jax.numpy as jnp
from jax.experimental import pallas as pl
from jax.experimental.pallas import tpu as pltpu

LN_EPS = 1e-5
NEG_INF = -1e30  # used instead of -inf in the causal mask


def _layer_norm(x, g, b):
    mu = jnp.mean(x, axis=-1, keepdims=True)
    var = jnp.mean((x - mu) ** 2, axis=-1, keepdims=True)
    return (x - mu) * jax.lax.rsqrt(var + LN_EPS) * g + b


# ----------------------------------------------------------------------------
# Kernel 1: the whole CLIP transformer (L fused residual blocks).
#   grid = (B // Bt, L); residual stream kept in f32 VMEM scratch across layers.
# ----------------------------------------------------------------------------
def _tower_kernel(x_ref,
                  ln1_g, ln1_b, w_in, b_in, w_out, b_out,
                  ln2_g, ln2_b, w_fc, b_fc, w_pj, b_pj,
                  o_ref, acc_ref, att_ref, *, num_heads):
    bt, S, D = x_ref.shape
    M = bt * S
    Dh = D // num_heads
    scale = 1.0 / float(Dh) ** 0.5
    l = pl.program_id(1)

    # Initialize the resident residual stream from the input at layer 0.
    @pl.when(l == 0)
    def _():
        acc_ref[...] = x_ref[...].reshape(M, D).astype(jnp.float32)

    x = acc_ref[...]                                    # (M, D) f32
    cd = w_in.dtype                                     # MXU input dtype (f32 or bf16)

    # ---- self-attention sub-block (pre-LN, causal) ----
    y = _layer_norm(x, ln1_g[0], ln1_b[0])
    qkv = jnp.dot(y.astype(cd), w_in[0],
                  preferred_element_type=jnp.float32) + b_in[0]     # (M, 3D)
    q = qkv[:, :D].reshape(bt, S, D)
    k = qkv[:, D:2 * D].reshape(bt, S, D)
    v = qkv[:, 2 * D:].reshape(bt, S, D)

    rows = jax.lax.broadcasted_iota(jnp.int32, (S, S), 0)
    cols = jax.lax.broadcasted_iota(jnp.int32, (S, S), 1)
    keep = (cols <= rows)[None]                         # (1, S, S) causal mask

    for h in range(num_heads):                          # static unroll over heads
        sl = slice(h * Dh, (h + 1) * Dh)
        s = jnp.einsum("bqd,bkd->bqk",
                       q[..., sl].astype(cd), k[..., sl].astype(cd),
                       preferred_element_type=jnp.float32) * scale
        s = jnp.where(keep, s, NEG_INF)
        m = jnp.max(s, axis=-1, keepdims=True)
        p = jnp.exp(s - m)
        denom = jnp.sum(p, axis=-1, keepdims=True)
        oh = jnp.einsum("bqk,bkd->bqd",
                        p.astype(cd), v[..., sl].astype(cd),
                        preferred_element_type=jnp.float32)
        # normalize after p@v (O(S*Dh) muls instead of O(S*S) divides), EUP reciprocal
        att_ref[:, :, sl] = oh * pl.reciprocal(denom, approx=True)

    att = att_ref[...].reshape(M, D)
    x = x + jnp.dot(att.astype(cd), w_out[0],
                    preferred_element_type=jnp.float32) + b_out[0]

    # ---- MLP sub-block (QuickGELU, as in CLIP) ----
    y2 = _layer_norm(x, ln2_g[0], ln2_b[0])
    h1 = jnp.dot(y2.astype(cd), w_fc[0],
                 preferred_element_type=jnp.float32) + b_fc[0]
    h1 = h1 * jax.nn.sigmoid(1.702 * h1)
    x = x + jnp.dot(h1.astype(cd), w_pj[0],
                    preferred_element_type=jnp.float32) + b_pj[0]

    acc_ref[...] = x

    @pl.when(l == pl.num_programs(1) - 1)
    def _():
        o_ref[...] = x.reshape(bt, S, D).astype(o_ref.dtype)


_TOWER_ORDER = ("ln1_g", "ln1_b", "w_in", "b_in", "w_out", "b_out",
                "ln2_g", "ln2_b", "w_fc", "b_fc", "w_pj", "b_pj")


def _pick_batch_tile(B, S, D, itemsize, row_target=512, budget=12 << 20):
    """Largest divisor of B keeping Bt*S <= row_target and activations within budget."""
    best = 1
    for d in range(1, B + 1):
        if B % d:
            continue
        rows = d * S
        # rough per-step footprint: f32 scratches + f32 temps (qkv/h1) + pipelined io
        approx = rows * D * (2 * 4 + 8 * 4 + 4 * itemsize)
        if rows <= row_target and approx <= budget:
            best = d
    return best


def _stack_layer_params(layers, param_dtype):
    """Stack per-layer params to (L, ...) and pre-transpose the big matrices."""
    def stack(fn, dtype):
        return jnp.stack([fn(l) for l in layers], axis=0).astype(dtype)

    return dict(
        ln1_g=stack(lambda l: l["ln1_g"].reshape(1, -1), jnp.float32),
        ln1_b=stack(lambda l: l["ln1_b"].reshape(1, -1), jnp.float32),
        w_in=stack(lambda l: l["in_w"].T, param_dtype),        # (L, D, 3D)
        b_in=stack(lambda l: l["in_b"].reshape(1, -1), jnp.float32),
        w_out=stack(lambda l: l["out_w"].T, param_dtype),      # (L, D, D)
        b_out=stack(lambda l: l["out_b"].reshape(1, -1), jnp.float32),
        ln2_g=stack(lambda l: l["ln2_g"].reshape(1, -1), jnp.float32),
        ln2_b=stack(lambda l: l["ln2_b"].reshape(1, -1), jnp.float32),
        w_fc=stack(lambda l: l["fc_w"].T, param_dtype),        # (L, D, 4D)
        b_fc=stack(lambda l: l["fc_b"].reshape(1, -1), jnp.float32),
        w_pj=stack(lambda l: l["pj_w"].T, param_dtype),        # (L, 4D, D)
        b_pj=stack(lambda l: l["pj_b"].reshape(1, -1), jnp.float32),
    )


def clip_text_tower(x, stacked, num_heads):
    B, S, D = x.shape
    L = stacked["w_in"].shape[0]
    bt = _pick_batch_tile(B, S, D, x.dtype.itemsize)
    weights = [stacked[k] for k in _TOWER_ORDER]

    def wspec(arr):
        nd = arr.ndim - 1
        return pl.BlockSpec((1,) + arr.shape[1:],
                            lambda b, l, _nd=nd: (l,) + (0,) * _nd)

    in_specs = [pl.BlockSpec((bt, S, D), lambda b, l: (b, 0, 0))] + \
               [wspec(w) for w in weights]

    # Size the scoped VMEM limit to double-buffered blocks + scratch (+ headroom).
    blk_bytes = 2 * bt * S * D * x.dtype.itemsize                     # in + out block
    wgt_bytes = sum((w.size // w.shape[0]) * w.dtype.itemsize for w in weights)
    scratch_bytes = 2 * bt * S * D * 4
    needed = 2 * (blk_bytes + wgt_bytes) + scratch_bytes + (8 << 20)
    vmem_limit = int(min(64 << 20, max(32 << 20, needed)))

    return pl.pallas_call(
        functools.partial(_tower_kernel, num_heads=num_heads),
        out_shape=jax.ShapeDtypeStruct((B, S, D), x.dtype),
        grid_spec=pltpu.PrefetchScalarGridSpec(
            num_scalar_prefetch=0,
            grid=(B // bt, L),
            in_specs=in_specs,
            out_specs=pl.BlockSpec((bt, S, D), lambda b, l: (b, 0, 0)),
            scratch_shapes=[pltpu.VMEM((bt * S, D), jnp.float32),   # residual stream
                            pltpu.VMEM((bt, S, D), jnp.float32)],   # attention output
        ),
        compiler_params=pltpu.CompilerParams(
            dimension_semantics=("parallel", "arbitrary"),
            vmem_limit_bytes=vmem_limit),
    )(x, *weights)


# ----------------------------------------------------------------------------
# Kernel 2: ln_final + gather at EOT (argmax) position + text projection.
#   Grid over batch tiles; only the (Bt,S,D) slice of x is resident per step,
#   EOT rows gathered into a (Bt,D) scratch, then one (Bt,D)@(D,Pp) matmul.
# ----------------------------------------------------------------------------
def _final_kernel(eot_ref, x_ref, g_ref, b_ref, proj_ref, o_ref, gath_ref):
    bt = x_ref.shape[0]
    i = pl.program_id(0)
    for jj in range(bt):                                  # static unroll
        idx = eot_ref[i * bt + jj]
        gath_ref[pl.ds(jj, 1), :] = x_ref[jj, pl.ds(idx, 1), :].astype(jnp.float32)
    g = _layer_norm(gath_ref[...], g_ref[...], b_ref[...])
    o_ref[...] = jnp.dot(g.astype(proj_ref.dtype), proj_ref[...],
                         preferred_element_type=jnp.float32).astype(o_ref.dtype)


def final_projection(x, eot, g, b, proj, param_dtype):
    B, S, D = x.shape
    P = proj.shape[1]
    Pp = max(128, ((P + 127) // 128) * 128)               # lane-dense output slab
    proj_p = jnp.zeros((D, Pp), param_dtype).at[:, :P].set(proj.astype(param_dtype))

    # batch tile: largest divisor of B that keeps the x block modest and either
    # equals B or is sublane-aligned for the (bt, Pp) output block.
    bt = 1
    for d in range(1, B + 1):
        if B % d:
            continue
        if (d == B or d % 8 == 0) and d <= 256 and \
                d * S * D * x.dtype.itemsize <= (4 << 20):
            bt = d

    out = pl.pallas_call(
        _final_kernel,
        out_shape=jax.ShapeDtypeStruct((B, Pp), x.dtype),
        grid_spec=pltpu.PrefetchScalarGridSpec(
            num_scalar_prefetch=1,
            grid=(B // bt,),
            in_specs=[pl.BlockSpec((bt, S, D), lambda i, eot: (i, 0, 0)),
                      pl.BlockSpec((1, D), lambda i, eot: (0, 0)),
                      pl.BlockSpec((1, D), lambda i, eot: (0, 0)),
                      pl.BlockSpec((D, Pp), lambda i, eot: (0, 0))],
            out_specs=pl.BlockSpec((bt, Pp), lambda i, eot: (i, 0)),
            scratch_shapes=[pltpu.VMEM((bt, D), jnp.float32)],
        ),
        compiler_params=pltpu.CompilerParams(dimension_semantics=("parallel",)),
    )(eot, x,
      g.reshape(1, D).astype(jnp.float32),
      b.reshape(1, D).astype(jnp.float32),
      proj_p)
    return out[:, :P]


# ----------------------------------------------------------------------------
# TextEncoder.forward
# ----------------------------------------------------------------------------
def text_encoder_forward(prompts, tokenized_prompts, params, num_heads,
                         param_dtype=jnp.float32):
    # x = prompts + positional_embedding   (glue elementwise add)
    x = prompts + params["pos_emb"][None].astype(prompts.dtype)
    stacked = _stack_layer_params(params["layers"], param_dtype)
    x = clip_text_tower(x, stacked, num_heads)
    eot = jnp.argmax(tokenized_prompts, axis=-1).astype(jnp.int32)   # glue
    return final_projection(x, eot, params["ln_final_g"], params["ln_final_b"],
                            params["text_projection"], param_dtype)


# ----------------------------------------------------------------------------
# Deterministic synthetic parameters and pure-JAX reference.
# ----------------------------------------------------------------------------
def init_params(key, *, D, L, P, S):
    keys = jax.random.split(key, 2 + 4 * L)
    ones = jnp.ones((D,), jnp.float32)
    zeros = jnp.zeros((D,), jnp.float32)
    params = {
        "pos_emb": 0.01 * jax.random.normal(keys[0], (S, D), jnp.float32),
        "text_projection": 0.02 * jax.random.normal(keys[1], (D, P), jnp.float32),
        "ln_final_g": ones,
        "ln_final_b": zeros,
        "layers": [],
    }
    ki = 2
    for _ in range(L):
        params["layers"].append({
            "ln1_g": ones, "ln1_b": zeros,
            "in_w": 0.02 * jax.random.normal(keys[ki], (3 * D, D), jnp.float32),
            "in_b": jnp.zeros((3 * D,), jnp.float32),
            "out_w": 0.02 * jax.random.normal(keys[ki + 1], (D, D), jnp.float32),
            "out_b": zeros,
            "ln2_g": ones, "ln2_b": zeros,
            "fc_w": 0.02 * jax.random.normal(keys[ki + 2], (4 * D, D), jnp.float32),
            "fc_b": jnp.zeros((4 * D,), jnp.float32),
            "pj_w": 0.02 * jax.random.normal(keys[ki + 3], (D, 4 * D), jnp.float32),
            "pj_b": zeros,
        })
        ki += 4
    return params


def reference_forward(prompts, tokenized_prompts, params, num_heads):
    x = prompts + params["pos_emb"][None]
    B, S, D = x.shape
    Dh = D // num_heads
    r = jnp.arange(S)[:, None]
    c = jnp.arange(S)[None, :]
    causal = jnp.where(c <= r, 0.0, NEG_INF)
    for layer in params["layers"]:
        y = _layer_norm(x, layer["ln1_g"], layer["ln1_b"])
        qkv = y @ layer["in_w"].T + layer["in_b"]
        q, k, v = jnp.split(qkv, 3, axis=-1)
        heads = lambda t: t.reshape(B, S, num_heads, Dh).transpose(0, 2, 1, 3)
        qh, kh, vh = heads(q), heads(k), heads(v)
        s = jnp.einsum("bhqd,bhkd->bhqk", qh, kh) / (Dh ** 0.5) + causal
        p = jax.nn.softmax(s, axis=-1)
        att = jnp.einsum("bhqk,bhkd->bhqd", p, vh).transpose(0, 2, 1, 3)
        att = att.reshape(B, S, D)
        x = x + att @ layer["out_w"].T + layer["out_b"]
        y2 = _layer_norm(x, layer["ln2_g"], layer["ln2_b"])
        h1 = y2 @ layer["fc_w"].T + layer["fc_b"]
        h1 = h1 * jax.nn.sigmoid(1.702 * h1)
        x = x + h1 @ layer["pj_w"].T + layer["pj_b"]
    eot = jnp.argmax(tokenized_prompts, axis=-1)
    xf = _layer_norm(x, params["ln_final_g"], params["ln_final_b"])
    sel = xf[jnp.arange(B), eot]
    return sel @ params["text_projection"]


if __name__ == "__main__":
    B, S, D, H, L, P = 4, 8, 32, 4, 2, 16   # batch, seq, width, heads, layers, embed

    key = jax.random.PRNGKey(0)
    kp, kt, kinit = jax.random.split(key, 3)
    params = init_params(kinit, D=D, L=L, P=P, S=S)

    prompts = jax.random.normal(kp, (B, S, D), jnp.float32)
    tokenized_prompts = jax.random.randint(kt, (B, S), 1, 400, dtype=jnp.int32)
    # place an "EOT" token (largest id) at a known position per prompt
    for bb, pos in enumerate([5, 3, 7, 1]):
        tokenized_prompts = tokenized_prompts.at[bb, pos].set(49407)

    ref = reference_forward(prompts, tokenized_prompts, params, num_heads=H)

    # f32 weights / activations: tight check against the f32 reference.
    out = text_encoder_forward(prompts, tokenized_prompts, params, num_heads=H)
    out = jax.block_until_ready(out)
    assert out.shape == (B, P), out.shape
    assert jnp.allclose(out, ref, atol=1e-3, rtol=1e-3), \
        float(jnp.max(jnp.abs(out - ref)))

    # bf16 weights + bf16 MXU inputs (f32 accumulation / LN / softmax): loose check.
    out_bf = text_encoder_forward(prompts.astype(jnp.bfloat16), tokenized_prompts,
                                  params, num_heads=H, param_dtype=jnp.bfloat16)
    out_bf = jax.block_until_ready(out_bf).astype(jnp.float32)
    assert out_bf.shape == (B, P), out_bf.shape
    assert jnp.allclose(out_bf, ref, atol=5e-2, rtol=5e-2), \
        float(jnp.max(jnp.abs(out_bf - ref)))

    print("KERNEL_OK")
</pallas_src>

<mosaic_0001>
module attributes {stable_mosaic.version = 11 : i64} {
  func.func @_tower_kernel(%arg0: i32, %arg1: i32, %arg2: memref<4x8x32xf32, #tpu.memory_space<vmem>>, %arg3: memref<1x1x32xf32, #tpu.memory_space<vmem>>, %arg4: memref<1x1x32xf32, #tpu.memory_space<vmem>>, %arg5: memref<1x32x96xf32, #tpu.memory_space<vmem>>, %arg6: memref<1x1x96xf32, #tpu.memory_space<vmem>>, %arg7: memref<1x32x32xf32, #tpu.memory_space<vmem>>, %arg8: memref<1x1x32xf32, #tpu.memory_space<vmem>>, %arg9: memref<1x1x32xf32, #tpu.memory_space<vmem>>, %arg10: memref<1x1x32xf32, #tpu.memory_space<vmem>>, %arg11: memref<1x32x128xf32, #tpu.memory_space<vmem>>, %arg12: memref<1x1x128xf32, #tpu.memory_space<vmem>>, %arg13: memref<1x128x32xf32, #tpu.memory_space<vmem>>, %arg14: memref<1x1x32xf32, #tpu.memory_space<vmem>>, %arg15: memref<4x8x32xf32, #tpu.memory_space<vmem>>, %arg16: memref<32x32xf32, #tpu.memory_space<vmem>>, %arg17: memref<4x8x32xf32, #tpu.memory_space<vmem>>) attributes {dimension_semantics = [#tpu.dimension_semantics<parallel>, #tpu.dimension_semantics<arbitrary>], iteration_bounds = array<i64: 1, 2>, scalar_prefetch = 0 : i64, scratch_operands = 2 : i64, tpu.core_type = #tpu.core_type<tc>, window_params = [{transform_indices = @transform_0, window_bounds = array<i64: 4, 8, 32>}, {transform_indices = @transform_1, window_bounds = array<i64: 1, 1, 32>}, {transform_indices = @transform_2, window_bounds = array<i64: 1, 1, 32>}, {transform_indices = @transform_3, window_bounds = array<i64: 1, 32, 96>}, {transform_indices = @transform_4, window_bounds = array<i64: 1, 1, 96>}, {transform_indices = @transform_5, window_bounds = array<i64: 1, 32, 32>}, {transform_indices = @transform_6, window_bounds = array<i64: 1, 1, 32>}, {transform_indices = @transform_7, window_bounds = array<i64: 1, 1, 32>}, {transform_indices = @transform_8, window_bounds = array<i64: 1, 1, 32>}, {transform_indices = @transform_9, window_bounds = array<i64: 1, 32, 128>}, {transform_indices = @transform_10, window_bounds = array<i64: 1, 1, 128>}, {transform_indices = @transform_11, window_bounds = array<i64: 1, 128, 32>}, {transform_indices = @transform_12, window_bounds = array<i64: 1, 1, 32>}, {transform_indices = @transform_13, window_bounds = array<i64: 4, 8, 32>}]} {
    %c0_i32 = arith.constant 0 : i32
    %0 = arith.cmpi eq, %arg1, %c0_i32 : i32
    %1 = arith.extui %0 : i1 to i32
    %c0_i32_0 = arith.constant 0 : i32
    %2 = arith.cmpi ne, %1, %c0_i32_0 : i32
    scf.if %2 {
      %c0_92 = arith.constant 0 : index
      %c0_93 = arith.constant 0 : index
      %c0_94 = arith.constant 0 : index
      %198 = vector.load %arg2[%c0_92, %c0_93, %c0_94] : memref<4x8x32xf32, #tpu.memory_space<vmem>>, vector<4x8x32xf32>
      %199 = vector.shape_cast %198 : vector<4x8x32xf32> to vector<32x32xf32>
      %c0_95 = arith.constant 0 : index
      %c0_96 = arith.constant 0 : index
      %200 = vector.load %arg16[%c0_95, %c0_96] : memref<32x32xf32, #tpu.memory_space<vmem>>, vector<32x32xf32>
      tpu.vector_store %arg16[%c0_95, %c0_96], %199 {strides = array<i32>} : memref<32x32xf32, #tpu.memory_space<vmem>>, vector<32x32xf32>,
    } else {
    }
    %c0 = arith.constant 0 : index
    %c0_1 = arith.constant 0 : index
    %3 = vector.load %arg16[%c0, %c0_1] : memref<32x32xf32, #tpu.memory_space<vmem>>, vector<32x32xf32>
    %c0_2 = arith.constant 0 : index
    %c0_3 = arith.constant 0 : index
    %c0_4 = arith.constant 0 : index
    %4 = vector.load %arg3[%c0_2, %c0_3, %c0_4] : memref<1x1x32xf32, #tpu.memory_space<vmem>>, vector<1x1x32xf32>
    %5 = vector.shape_cast %4 : vector<1x1x32xf32> to vector<1x32xf32>
    %c0_5 = arith.constant 0 : index
    %c0_6 = arith.constant 0 : index
    %c0_7 = arith.constant 0 : index
    %6 = vector.load %arg4[%c0_5, %c0_6, %c0_7] : memref<1x1x32xf32, #tpu.memory_space<vmem>>, vector<1x1x32xf32>
    %7 = vector.shape_cast %6 : vector<1x1x32xf32> to vector<1x32xf32>
    %cst = arith.constant dense<0.000000e+00> : vector<32xf32>
    %8 = vector.multi_reduction <add>, %3, %cst [1] : vector<32x32xf32> to vector<32xf32>
    %9 = vector.shape_cast %8 : vector<32xf32> to vector<32x1xf32>
    %cst_8 = arith.constant 3.200000e+01 : f32
    %10 = vector.broadcast %cst_8 : f32 to vector<32x1xf32>
    %11 = arith.divf %9, %10 : vector<32x1xf32>
    %12 = vector.broadcast %11 : vector<32x1xf32> to vector<32x32xf32>
    %13 = arith.subf %3, %12 : vector<32x32xf32>
    %14 = arith.mulf %13, %13 : vector<32x32xf32>
    %cst_9 = arith.constant dense<0.000000e+00> : vector<32xf32>
    %15 = vector.multi_reduction <add>, %14, %cst_9 [1] : vector<32x32xf32> to vector<32xf32>
    %16 = vector.shape_cast %15 : vector<32xf32> to vector<32x1xf32>
    %cst_10 = arith.constant 3.200000e+01 : f32
    %17 = vector.broadcast %cst_10 : f32 to vector<32x1xf32>
    %18 = arith.divf %16, %17 : vector<32x1xf32>
    %19 = vector.broadcast %11 : vector<32x1xf32> to vector<32x32xf32>
    %20 = arith.subf %3, %19 : vector<32x32xf32>
    %cst_11 = arith.constant 9.99999974E-6 : f32
    %21 = vector.broadcast %cst_11 : f32 to vector<32x1xf32>
    %22 = arith.addf %18, %21 : vector<32x1xf32>
    %23 = math.rsqrt %22 : vector<32x1xf32>
    %24 = vector.broadcast %23 : vector<32x1xf32> to vector<32x32xf32>
    %25 = arith.mulf %20, %24 : vector<32x32xf32>
    %26 = vector.broadcast %5 : vector<1x32xf32> to vector<32x32xf32>
    %27 = arith.mulf %25, %26 : vector<32x32xf32>
    %28 = vector.broadcast %7 : vector<1x32xf32> to vector<32x32xf32>
    %29 = arith.addf %27, %28 : vector<32x32xf32>
    %c0_12 = arith.constant 0 : index
    %c0_13 = arith.constant 0 : index
    %c0_14 = arith.constant 0 : index
    %30 = vector.load %arg5[%c0_12, %c0_13, %c0_14] : memref<1x32x96xf32, #tpu.memory_space<vmem>>, vector<1x32x96xf32>
    %31 = vector.shape_cast %30 : vector<1x32x96xf32> to vector<32x96xf32>
    %cst_15 = arith.constant dense<0.000000e+00> : vector<32x96xf32>
    %32 = tpu.matmul %29, %31, %cst_15 {dimension_numbers = #tpu.dot_dimension_numbers<[1], [0], [0], [1], [0, 0, 1, 1], [], []>} : vector<32x32xf32>, vector<32x96xf32>, vector<32x96xf32> -> vector<32x96xf32>
    %c0_16 = arith.constant 0 : index
    %c0_17 = arith.constant 0 : index
    %c0_18 = arith.constant 0 : index
    %33 = vector.load %arg6[%c0_16, %c0_17, %c0_18] : memref<1x1x96xf32, #tpu.memory_space<vmem>>, vector<1x1x96xf32>
    %34 = vector.shape_cast %33 : vector<1x1x96xf32> to vector<1x96xf32>
    %35 = vector.broadcast %34 : vector<1x96xf32> to vector<32x96xf32>
    %36 = arith.addf %32, %35 : vector<32x96xf32>
    %37 = vector.extract_strided_slice %36 {offsets = [0, 0], sizes = [32, 32], strides = [1, 1]} : vector<32x96xf32> to vector<32x32xf32>
    %38 = vector.shape_cast %37 : vector<32x32xf32> to vector<4x8x32xf32>
    %39 = vector.extract_strided_slice %36 {offsets = [0, 32], sizes = [32, 32], strides = [1, 1]} : vector<32x96xf32> to vector<32x32xf32>
    %40 = vector.shape_cast %39 : vector<32x32xf32> to vector<4x8x32xf32>
    %41 = vector.extract_strided_slice %36 {offsets = [0, 64], sizes = [32, 32], strides = [1, 1]} : vector<32x96xf32> to vector<32x32xf32>
    %42 = vector.shape_cast %41 : vector<32x32xf32> to vector<4x8x32xf32>
    %43 = tpu.iota {dimensions = array<i32: 0>} : vector<8x8xi32>
    %44 = tpu.iota {dimensions = array<i32: 1>} : vector<8x8xi32>
    %45 = arith.cmpi sle, %44, %43 : vector<8x8xi32>
    %46 = vector.shape_cast %45 : vector<8x8xi1> to vector<1x8x8xi1>
    %47 = vector.extract_strided_slice %38 {offsets = [0, 0, 0], sizes = [4, 8, 8], strides = [1, 1, 1]} : vector<4x8x32xf32> to vector<4x8x8xf32>
    %48 = vector.extract_strided_slice %40 {offsets = [0, 0, 0], sizes = [4, 8, 8], strides = [1, 1, 1]} : vector<4x8x32xf32> to vector<4x8x8xf32>
    "tpu.trace_start"() <{level = 10 : i32, message = "bqd,bkd->bqk"}> : () -> ()
    %cst_19 = arith.constant dense<0.000000e+00> : vector<4x8x8xf32>
    %49 = tpu.matmul %47, %48, %cst_19 {dimension_numbers = #tpu.dot_dimension_numbers<[2], [2], [1], [1], [0, 0, 0, 1, 1, 1], [0], [0]>} : vector<4x8x8xf32>, vector<4x8x8xf32>, vector<4x8x8xf32> -> vector<4x8x8xf32>
    "tpu.trace_stop"() : () -> ()
    %cst_20 = arith.constant 0.353553385 : f32
    %50 = vector.broadcast %cst_20 : f32 to vector<4x8x8xf32>
    %51 = arith.mulf %49, %50 : vector<4x8x8xf32>
    %cst_21 = arith.constant -1.000000e+30 : f32
    %52 = vector.shape_cast %46 : vector<1x8x8xi1> to vector<1x8x8xi1>
    %53 = vector.broadcast %52 : vector<1x8x8xi1> to vector<4x8x8xi1>
    %54 = vector.broadcast %cst_21 : f32 to vector<4x8x8xf32>
    %55 = arith.select %53, %51, %54 : vector<4x8x8xi1>, vector<4x8x8xf32>
    %cst_22 = arith.constant dense<0xFF800000> : vector<4x8xf32>
    %56 = vector.multi_reduction <maximumf>, %55, %cst_22 [2] : vector<4x8x8xf32> to vector<4x8xf32>
    %57 = vector.shape_cast %56 : vector<4x8xf32> to vector<4x8x1xf32>
    %58 = vector.broadcast %57 : vector<4x8x1xf32> to vector<4x8x8xf32>
    %59 = arith.subf %55, %58 : vector<4x8x8xf32>
    %60 = math.exp %59 : vector<4x8x8xf32>
    %cst_23 = arith.constant dense<0.000000e+00> : vector<4x8xf32>
    %61 = vector.multi_reduction <add>, %60, %cst_23 [2] : vector<4x8x8xf32> to vector<4x8xf32>
    %62 = vector.shape_cast %61 : vector<4x8xf32> to vector<4x8x1xf32>
    %63 = vector.extract_strided_slice %42 {offsets = [0, 0, 0], sizes = [4, 8, 8], strides = [1, 1, 1]} : vector<4x8x32xf32> to vector<4x8x8xf32>
    "tpu.trace_start"() <{level = 10 : i32, message = "bqk,bkd->bqd"}> : () -> ()
    %cst_24 = arith.constant dense<0.000000e+00> : vector<4x8x8xf32>
    %64 = tpu.matmul %60, %63, %cst_24 {dimension_numbers = #tpu.dot_dimension_numbers<[2], [1], [1], [2], [0, 0, 0, 1, 1, 2], [0], [0]>} : vector<4x8x8xf32>, vector<4x8x8xf32>, vector<4x8x8xf32> -> vector<4x8x8xf32>
    "tpu.trace_stop"() : () -> ()
    %65 = tpu.reciprocal %62 {approx = true} : vector<4x8x1xf32> -> vector<4x8x1xf32>
    %66 = vector.broadcast %65 : vector<4x8x1xf32> to vector<4x8x8xf32>
    %67 = arith.mulf %64, %66 : vector<4x8x8xf32>
    %c0_25 = arith.constant 0 : index
    %c0_26 = arith.constant 0 : index
    %c0_27 = arith.constant 0 : index
    %68 = vector.load %arg17[%c0_25, %c0_26, %c0_27] : memref<4x8x32xf32, #tpu.memory_space<vmem>>, vector<4x8x8xf32>
    tpu.vector_store %arg17[%c0_25, %c0_26, %c0_27], %67 {strides = array<i32>} : memref<4x8x32xf32, #tpu.memory_space<vmem>>, vector<4x8x8xf32>,
    %69 = vector.extract_strided_slice %38 {offsets = [0, 0, 8], sizes = [4, 8, 8], strides = [1, 1, 1]} : vector<4x8x32xf32> to vector<4x8x8xf32>
    %70 = vector.extract_strided_slice %40 {offsets = [0, 0, 8], sizes = [4, 8, 8], strides = [1, 1, 1]} : vector<4x8x32xf32> to vector<4x8x8xf32>
    "tpu.trace_start"() <{level = 10 : i32, message = "bqd,bkd->bqk"}> : () -> ()
    %cst_28 = arith.constant dense<0.000000e+00> : vector<4x8x8xf32>
    %71 = tpu.matmul %69, %70, %cst_28 {dimension_numbers = #tpu.dot_dimension_numbers<[2], [2], [1], [1], [0, 0, 0, 1, 1, 1], [0], [0]>} : vector<4x8x8xf32>, vector<4x8x8xf32>, vector<4x8x8xf32> -> vector<4x8x8xf32>
    "tpu.trace_stop"() : () -> ()
    %cst_29 = arith.constant 0.353553385 : f32
    %72 = vector.broadcast %cst_29 : f32 to vector<4x8x8xf32>
    %73 = arith.mulf %71, %72 : vector<4x8x8xf32>
    %cst_30 = arith.constant -1.000000e+30 : f32
    %74 = vector.shape_cast %46 : vector<1x8x8xi1> to vector<1x8x8xi1>
    %75 = vector.broadcast %74 : vector<1x8x8xi1> to vector<4x8x8xi1>
    %76 = vector.broadcast %cst_30 : f32 to vector<4x8x8xf32>
    %77 = arith.select %75, %73, %76 : vector<4x8x8xi1>, vector<4x8x8xf32>
    %cst_31 = arith.constant dense<0xFF800000> : vector<4x8xf32>
    %78 = vector.multi_reduction <maximumf>, %77, %cst_31 [2] : vector<4x8x8xf32> to vector<4x8xf32>
    %79 = vector.shape_cast %78 : vector<4x8xf32> to vector<4x8x1xf32>
    %80 = vector.broadcast %79 : vector<4x8x1xf32> to vector<4x8x8xf32>
    %81 = arith.subf %77, %80 : vector<4x8x8xf32>
    %82 = math.exp %81 : vector<4x8x8xf32>
    %cst_32 = arith.constant dense<0.000000e+00> : vector<4x8xf32>
    %83 = vector.multi_reduction <add>, %82, %cst_32 [2] : vector<4x8x8xf32> to vector<4x8xf32>
    %84 = vector.shape_cast %83 : vector<4x8xf32> to vector<4x8x1xf32>
    %85 = vector.extract_strided_slice %42 {offsets = [0, 0, 8], sizes = [4, 8, 8], strides = [1, 1, 1]} : vector<4x8x32xf32> to vector<4x8x8xf32>
    "tpu.trace_start"() <{level = 10 : i32, message = "bqk,bkd->bqd"}> : () -> ()
    %cst_33 = arith.constant dense<0.000000e+00> : vector<4x8x8xf32>
    %86 = tpu.matmul %82, %85, %cst_33 {dimension_numbers = #tpu.dot_dimension_numbers<[2], [1], [1], [2], [0, 0, 0, 1, 1, 2], [0], [0]>} : vector<4x8x8xf32>, vector<4x8x8xf32>, vector<4x8x8xf32> -> vector<4x8x8xf32>
    "tpu.trace_stop"() : () -> ()
    %87 = tpu.reciprocal %84 {approx = true} : vector<4x8x1xf32> -> vector<4x8x1xf32>
    %88 = vector.broadcast %87 : vector<4x8x1xf32> to vector<4x8x8xf32>
    %89 = arith.mulf %86, %88 : vector<4x8x8xf32>
    %c0_34 = arith.constant 0 : index
    %c0_35 = arith.constant 0 : index
    %c8 = arith.constant 8 : index
    %90 = vector.load %arg17[%c0_34, %c0_35, %c8] : memref<4x8x32xf32, #tpu.memory_space<vmem>>, vector<4x8x8xf32>
    tpu.vector_store %arg17[%c0_34, %c0_35, %c8], %89 {strides = array<i32>} : memref<4x8x32xf32, #tpu.memory_space<vmem>>, vector<4x8x8xf32>,
    %91 = vector.extract_strided_slice %38 {offsets = [0, 0, 16], sizes = [4, 8, 8], strides = [1, 1, 1]} : vector<4x8x32xf32> to vector<4x8x8xf32>
    %92 = vector.extract_strided_slice %40 {offsets = [0, 0, 16], sizes = [4, 8, 8], strides = [1, 1, 1]} : vector<4x8x32xf32> to vector<4x8x8xf32>
    "tpu.trace_start"() <{level = 10 : i32, message = "bqd,bkd->bqk"}> : () -> ()
    %cst_36 = arith.constant dense<0.000000e+00> : vector<4x8x8xf32>
    %93 = tpu.matmul %91, %92, %cst_36 {dimension_numbers = #tpu.dot_dimension_numbers<[2], [2], [1], [1], [0, 0, 0, 1, 1, 1], [0], [0]>} : vector<4x8x8xf32>, vector<4x8x8xf32>, vector<4x8x8xf32> -> vector<4x8x8xf32>
    "tpu.trace_stop"() : () -> ()
    %cst_37 = arith.constant 0.353553385 : f32
    %94 = vector.broadcast %cst_37 : f32 to vector<4x8x8xf32>
    %95 = arith.mulf %93, %94 : vector<4x8x8xf32>
    %cst_38 = arith.constant -1.000000e+30 : f32
    %96 = vector.shape_cast %46 : vector<1x8x8xi1> to vector<1x8x8xi1>
    %97 = vector.broadcast %96 : vector<1x8x8xi1> to vector<4x8x8xi1>
    %98 = vector.broadcast %cst_38 : f32 to vector<4x8x8xf32>
    %99 = arith.select %97, %95, %98 : vector<4x8x8xi1>, vector<4x8x8xf32>
    %cst_39 = arith.constant dense<0xFF800000> : vector<4x8xf32>
    %100 = vector.multi_reduction <maximumf>, %99, %cst_39 [2] : vector<4x8x8xf32> to vector<4x8xf32>
    %101 = vector.shape_cast %100 : vector<4x8xf32> to vector<4x8x1xf32>
    %102 = vector.broadcast %101 : vector<4x8x1xf32> to vector<4x8x8xf32>
    %103 = arith.subf %99, %102 : vector<4x8x8xf32>
    %104 = math.exp %103 : vector<4x8x8xf32>
    %cst_40 = arith.constant dense<0.000000e+00> : vector<4x8xf32>
    %105 = vector.multi_reduction <add>, %104, %cst_40 [2] : vector<4x8x8xf32> to vector<4x8xf32>
    %106 = vector.shape_cast %105 : vector<4x8xf32> to vector<4x8x1xf32>
    %107 = vector.extract_strided_slice %42 {offsets = [0, 0, 16], sizes = [4, 8, 8], strides = [1, 1, 1]} : vector<4x8x32xf32> to vector<4x8x8xf32>
    "tpu.trace_start"() <{level = 10 : i32, message = "bqk,bkd->bqd"}> : () -> ()
    %cst_41 = arith.constant dense<0.000000e+00> : vector<4x8x8xf32>
    %108 = tpu.matmul %104, %107, %cst_41 {dimension_numbers = #tpu.dot_dimension_numbers<[2], [1], [1], [2], [0, 0, 0, 1, 1, 2], [0], [0]>} : vector<4x8x8xf32>, vector<4x8x8xf32>, vector<4x8x8xf32> -> vector<4x8x8xf32>
    "tpu.trace_stop"() : () -> ()
    %109 = tpu.reciprocal %106 {approx = true} : vector<4x8x1xf32> -> vector<4x8x1xf32>
    %110 = vector.broadcast %109 : vector<4x8x1xf32> to vector<4x8x8xf32>
    %111 = arith.mulf %108, %110 : vector<4x8x8xf32>
    %c0_42 = arith.constant 0 : index
    %c0_43 = arith.constant 0 : index
    %c16 = arith.constant 16 : index
    %112 = vector.load %arg17[%c0_42, %c0_43, %c16] : memref<4x8x32xf32, #tpu.memory_space<vmem>>, vector<4x8x8xf32>
    tpu.vector_store %arg17[%c0_42, %c0_43, %c16], %111 {strides = array<i32>} : memref<4x8x32xf32, #tpu.memory_space<vmem>>, vector<4x8x8xf32>,
    %113 = vector.extract_strided_slice %38 {offsets = [0, 0, 24], sizes = [4, 8, 8], strides = [1, 1, 1]} : vector<4x8x32xf32> to vector<4x8x8xf32>
    %114 = vector.extract_strided_slice %40 {offsets = [0, 0, 24], sizes = [4, 8, 8], strides = [1, 1, 1]} : vector<4x8x32xf32> to vector<4x8x8xf32>
    "tpu.trace_start"() <{level = 10 : i32, message = "bqd,bkd->bqk"}> : () -> ()
    %cst_44 = arith.constant dense<0.000000e+00> : vector<4x8x8xf32>
    %115 = tpu.matmul %113, %114, %cst_44 {dimension_numbers = #tpu.dot_dimension_numbers<[2], [2], [1], [1], [0, 0, 0, 1, 1, 1], [0], [0]>} : vector<4x8x8xf32>, vector<4x8x8xf32>, vector<4x8x8xf32> -> vector<4x8x8xf32>
    "tpu.trace_stop"() : () -> ()
    %cst_45 = arith.constant 0.353553385 : f32
    %116 = vector.broadcast %cst_45 : f32 to vector<4x8x8xf32>
    %117 = arith.mulf %115, %116 : vector<4x8x8xf32>
    %cst_46 = arith.constant -1.000000e+30 : f32
    %118 = vector.shape_cast %46 : vector<1x8x8xi1> to vector<1x8x8xi1>
    %119 = vector.broadcast %118 : vector<1x8x8xi1> to vector<4x8x8xi1>
    %120 = vector.broadcast %cst_46 : f32 to vector<4x8x8xf32>
    %121 = arith.select %119, %117, %120 : vector<4x8x8xi1>, vector<4x8x8xf32>
    %cst_47 = arith.constant dense<0xFF800000> : vector<4x8xf32>
    %122 = vector.multi_reduction <maximumf>, %121, %cst_47 [2] : vector<4x8x8xf32> to vector<4x8xf32>
    %123 = vector.shape_cast %122 : vector<4x8xf32> to vector<4x8x1xf32>
    %124 = vector.broadcast %123 : vector<4x8x1xf32> to vector<4x8x8xf32>
    %125 = arith.subf %121, %124 : vector<4x8x8xf32>
    %126 = math.exp %125 : vector<4x8x8xf32>
    %cst_48 = arith.constant dense<0.000000e+00> : vector<4x8xf32>
    %127 = vector.multi_reduction <add>, %126, %cst_48 [2] : vector<4x8x8xf32> to vector<4x8xf32>
    %128 = vector.shape_cast %127 : vector<4x8xf32> to vector<4x8x1xf32>
    %129 = vector.extract_strided_slice %42 {offsets = [0, 0, 24], sizes = [4, 8, 8], strides = [1, 1, 1]} : vector<4x8x32xf32> to vector<4x8x8xf32>
    "tpu.trace_start"() <{level = 10 : i32, message = "bqk,bkd->bqd"}> : () -> ()
    %cst_49 = arith.constant dense<0.000000e+00> : vector<4x8x8xf32>
    %130 = tpu.matmul %126, %129, %cst_49 {dimension_numbers = #tpu.dot_dimension_numbers<[2], [1], [1], [2], [0, 0, 0, 1, 1, 2], [0], [0]>} : vector<4x8x8xf32>, vector<4x8x8xf32>, vector<4x8x8xf32> -> vector<4x8x8xf32>
    "tpu.trace_stop"() : () -> ()
    %131 = tpu.reciprocal %128 {approx = true} : vector<4x8x1xf32> -> vector<4x8x1xf32>
    %132 = vector.broadcast %131 : vector<4x8x1xf32> to vector<4x8x8xf32>
    %133 = arith.mulf %130, %132 : vector<4x8x8xf32>
    %c0_50 = arith.constant 0 : index
    %c0_51 = arith.constant 0 : index
    %c24 = arith.constant 24 : index
    %134 = vector.load %arg17[%c0_50, %c0_51, %c24] : memref<4x8x32xf32, #tpu.memory_space<vmem>>, vector<4x8x8xf32>
    tpu.vector_store %arg17[%c0_50, %c0_51, %c24], %133 {strides = array<i32>} : memref<4x8x32xf32, #tpu.memory_space<vmem>>, vector<4x8x8xf32>,
    %c0_52 = arith.constant 0 : index
    %c0_53 = arith.constant 0 : index
    %c0_54 = arith.constant 0 : index
    %135 = vector.load %arg17[%c0_52, %c0_53, %c0_54] : memref<4x8x32xf32, #tpu.memory_space<vmem>>, vector<4x8x32xf32>
    %136 = vector.shape_cast %135 : vector<4x8x32xf32> to vector<32x32xf32>
    %c0_55 = arith.constant 0 : index
    %c0_56 = arith.constant 0 : index
    %c0_57 = arith.constant 0 : index
    %137 = vector.load %arg7[%c0_55, %c0_56, %c0_57] : memref<1x32x32xf32, #tpu.memory_space<vmem>>, vector<1x32x32xf32>
    %138 = vector.shape_cast %137 : vector<1x32x32xf32> to vector<32x32xf32>
    %cst_58 = arith.constant dense<0.000000e+00> : vector<32x32xf32>
    %139 = tpu.matmul %136, %138, %cst_58 {dimension_numbers = #tpu.dot_dimension_numbers<[1], [0], [0], [1], [0, 0, 1, 1], [], []>} : vector<32x32xf32>, vector<32x32xf32>, vector<32x32xf32> -> vector<32x32xf32>
    %140 = arith.addf %3, %139 : vector<32x32xf32>
    %c0_59 = arith.constant 0 : index
    %c0_60 = arith.constant 0 : index
    %c0_61 = arith.constant 0 : index
    %141 = vector.load %arg8[%c0_59, %c0_60, %c0_61] : memref<1x1x32xf32, #tpu.memory_space<vmem>>, vector<1x1x32xf32>
    %142 = vector.shape_cast %141 : vector<1x1x32xf32> to vector<1x32xf32>
    %143 = vector.broadcast %142 : vector<1x32xf32> to vector<32x32xf32>
    %144 = arith.addf %140, %143 : vector<32x32xf32>
    %c0_62 = arith.constant 0 : index
    %c0_63 = arith.constant 0 : index
    %c0_64 = arith.constant 0 : index
    %145 = vector.load %arg9[%c0_62, %c0_63, %c0_64] : memref<1x1x32xf32, #tpu.memory_space<vmem>>, vector<1x1x32xf32>
    %146 = vector.shape_cast %145 : vector<1x1x32xf32> to vector<1x32xf32>
    %c0_65 = arith.constant 0 : index
    %c0_66 = arith.constant 0 : index
    %c0_67 = arith.constant 0 : index
    %147 = vector.load %arg10[%c0_65, %c0_66, %c0_67] : memref<1x1x32xf32, #tpu.memory_space<vmem>>, vector<1x1x32xf32>
    %148 = vector.shape_cast %147 : vector<1x1x32xf32> to vector<1x32xf32>
    %cst_68 = arith.constant dense<0.000000e+00> : vector<32xf32>
    %149 = vector.multi_reduction <add>, %144, %cst_68 [1] : vector<32x32xf32> to vector<32xf32>
    %150 = vector.shape_cast %149 : vector<32xf32> to vector<32x1xf32>
    %cst_69 = arith.constant 3.200000e+01 : f32
    %151 = vector.broadcast %cst_69 : f32 to vector<32x1xf32>
    %152 = arith.divf %150, %151 : vector<32x1xf32>
    %153 = vector.broadcast %152 : vector<32x1xf32> to vector<32x32xf32>
    %154 = arith.subf %144, %153 : vector<32x32xf32>
    %155 = arith.mulf %154, %154 : vector<32x32xf32>
    %cst_70 = arith.constant dense<0.000000e+00> : vector<32xf32>
    %156 = vector.multi_reduction <add>, %155, %cst_70 [1] : vector<32x32xf32> to vector<32xf32>
    %157 = vector.shape_cast %156 : vector<32xf32> to vector<32x1xf32>
    %cst_71 = arith.constant 3.200000e+01 : f32
    %158 = vector.broadcast %cst_71 : f32 to vector<32x1xf32>
    %159 = arith.divf %157, %158 : vector<32x1xf32>
    %160 = vector.broadcast %152 : vector<32x1xf32> to vector<32x32xf32>
    %161 = arith.subf %144, %160 : vector<32x32xf32>
    %cst_72 = arith.constant 9.99999974E-6 : f32
    %162 = vector.broadcast %cst_72 : f32 to vector<32x1xf32>
    %163 = arith.addf %159, %162 : vector<32x1xf32>
    %164 = math.rsqrt %163 : vector<32x1xf32>
    %165 = vector.broadcast %164 : vector<32x1xf32> to vector<32x32xf32>
    %166 = arith.mulf %161, %165 : vector<32x32xf32>
    %167 = vector.broadcast %146 : vector<1x32xf32> to vector<32x32xf32>
    %168 = arith.mulf %166, %167 : vector<32x32xf32>
    %169 = vector.broadcast %148 : vector<1x32xf32> to vector<32x32xf32>
    %170 = arith.addf %168, %169 : vector<32x32xf32>
    %c0_73 = arith.constant 0 : index
    %c0_74 = arith.constant 0 : index
    %c0_75 = arith.constant 0 : index
    %171 = vector.load %arg11[%c0_73, %c0_74, %c0_75] : memref<1x32x128xf32, #tpu.memory_space<vmem>>, vector<1x32x128xf32>
    %172 = vector.shape_cast %171 : vector<1x32x128xf32> to vector<32x128xf32>
    %cst_76 = arith.constant dense<0.000000e+00> : vector<32x128xf32>
    %173 = tpu.matmul %170, %172, %cst_76 {dimension_numbers = #tpu.dot_dimension_numbers<[1], [0], [0], [1], [0, 0, 1, 1], [], []>} : vector<32x32xf32>, vector<32x128xf32>, vector<32x128xf32> -> vector<32x128xf32>
    %c0_77 = arith.constant 0 : index
    %c0_78 = arith.constant 0 : index
    %c0_79 = arith.constant 0 : index
    %174 = vector.load %arg12[%c0_77, %c0_78, %c0_79] : memref<1x1x128xf32, #tpu.memory_space<vmem>>, vector<1x1x128xf32>
    %175 = vector.shape_cast %174 : vector<1x1x128xf32> to vector<1x128xf32>
    %176 = vector.broadcast %175 : vector<1x128xf32> to vector<32x128xf32>
    %177 = arith.addf %173, %176 : vector<32x128xf32>
    %cst_80 = arith.constant 1.702000e+00 : f32
    %178 = vector.broadcast %cst_80 : f32 to vector<32x128xf32>
    %179 = arith.mulf %178, %177 : vector<32x128xf32>
    %180 = arith.negf %179 : vector<32x128xf32>
    %181 = math.exp %180 : vector<32x128xf32>
    %cst_81 = arith.constant 1.000000e+00 : f32
    %182 = vector.broadcast %cst_81 : f32 to vector<32x128xf32>
    %183 = arith.addf %182, %181 : vector<32x128xf32>
    %184 = arith.divf %182, %183 : vector<32x128xf32>
    %185 = arith.mulf %177, %184 : vector<32x128xf32>
    %c0_82 = arith.constant 0 : index
    %c0_83 = arith.constant 0 : index
    %c0_84 = arith.constant 0 : index
    %186 = vector.load %arg13[%c0_82, %c0_83, %c0_84] : memref<1x128x32xf32, #tpu.memory_space<vmem>>, vector<1x128x32xf32>
    %187 = vector.shape_cast %186 : vector<1x128x32xf32> to vector<128x32xf32>
    %cst_85 = arith.constant dense<0.000000e+00> : vector<32x32xf32>
    %188 = tpu.matmul %185, %187, %cst_85 {dimension_numbers = #tpu.dot_dimension_numbers<[1], [0], [0], [1], [0, 0, 1, 1], [], []>} : vector<32x128xf32>, vector<128x32xf32>, vector<32x32xf32> -> vector<32x32xf32>
    %189 = arith.addf %144, %188 : vector<32x32xf32>
    %c0_86 = arith.constant 0 : index
    %c0_87 = arith.constant 0 : index
    %c0_88 = arith.constant 0 : index
    %190 = vector.load %arg14[%c0_86, %c0_87, %c0_88] : memref<1x1x32xf32, #tpu.memory_space<vmem>>, vector<1x1x32xf32>
    %191 = vector.shape_cast %190 : vector<1x1x32xf32> to vector<1x32xf32>
    %192 = vector.broadcast %191 : vector<1x32xf32> to vector<32x32xf32>
    %193 = arith.addf %189, %192 : vector<32x32xf32>
    %c0_89 = arith.constant 0 : index
    %c0_90 = arith.constant 0 : index
    %194 = vector.load %arg16[%c0_89, %c0_90] : memref<32x32xf32, #tpu.memory_space<vmem>>, vector<32x32xf32>
    tpu.vector_store %arg16[%c0_89, %c0_90], %193 {strides = array<i32>} : memref<32x32xf32, #tpu.memory_space<vmem>>, vector<32x32xf32>,
    %c1_i32 = arith.constant 1 : i32
    %195 = arith.cmpi eq, %arg1, %c1_i32 : i32
    %196 = arith.extui %195 : i1 to i32
    %c0_i32_91 = arith.constant 0 : i32
    %197 = arith.cmpi ne, %196, %c0_i32_91 : i32
    scf.if %197 {
      %198 = vector.shape_cast %193 : vector<32x32xf32> to vector<4x8x32xf32>
      %c0_92 = arith.constant 0 : index
      %c0_93 = arith.constant 0 : index
      %c0_94 = arith.constant 0 : index
      %199 = vector.load %arg15[%c0_92, %c0_93, %c0_94] : memref<4x8x32xf32, #tpu.memory_space<vmem>>, vector<4x8x32xf32>
      tpu.vector_store %arg15[%c0_92, %c0_93, %c0_94], %198 {strides = array<i32>} : memref<4x8x32xf32, #tpu.memory_space<vmem>>, vector<4x8x32xf32>,
    } else {
    }
    return
  }
  func.func @transform_0(%arg0: i32, %arg1: i32) -> (i32, i32, i32) {
    %c0_i32 = arith.constant 0 : i32
    %c0_i32_0 = arith.constant 0 : i32
    %c0_i32_1 = arith.constant 0 : i32
    return %arg0, %c0_i32, %c0_i32_0 : i32, i32, i32
  }
  func.func @transform_1(%arg0: i32, %arg1: i32) -> (i32, i32, i32) {
    %c0_i32 = arith.constant 0 : i32
    %c0_i32_0 = arith.constant 0 : i32
    %c0_i32_1 = arith.constant 0 : i32
    return %arg1, %c0_i32, %c0_i32_0 : i32, i32, i32
  }
  func.func @transform_2(%arg0: i32, %arg1: i32) -> (i32, i32, i32) {
    %c0_i32 = arith.constant 0 : i32
    %c0_i32_0 = arith.constant 0 : i32
    %c0_i32_1 = arith.constant 0 : i32
    return %arg1, %c0_i32, %c0_i32_0 : i32, i32, i32
  }
  func.func @transform_3(%arg0: i32, %arg1: i32) -> (i32, i32, i32) {
    %c0_i32 = arith.constant 0 : i32
    %c0_i32_0 = arith.constant 0 : i32
    %c0_i32_1 = arith.constant 0 : i32
    return %arg1, %c0_i32, %c0_i32_0 : i32, i32, i32
  }
  func.func @transform_4(%arg0: i32, %arg1: i32) -> (i32, i32, i32) {
    %c0_i32 = arith.constant 0 : i32
    %c0_i32_0 = arith.constant 0 : i32
    %c0_i32_1 = arith.constant 0 : i32
    return %arg1, %c0_i32, %c0_i32_0 : i32, i32, i32
  }
  func.func @transform_5(%arg0: i32, %arg1: i32) -> (i32, i32, i32) {
    %c0_i32 = arith.constant 0 : i32
    %c0_i32_0 = arith.constant 0 : i32
    %c0_i32_1 = arith.constant 0 : i32
    return %arg1, %c0_i32, %c0_i32_0 : i32, i32, i32
  }
  func.func @transform_6(%arg0: i32, %arg1: i32) -> (i32, i32, i32) {
    %c0_i32 = arith.constant 0 : i32
    %c0_i32_0 = arith.constant 0 : i32
    %c0_i32_1 = arith.constant 0 : i32
    return %arg1, %c0_i32, %c0_i32_0 : i32, i32, i32
  }
  func.func @transform_7(%arg0: i32, %arg1: i32) -> (i32, i32, i32) {
    %c0_i32 = arith.constant 0 : i32
    %c0_i32_0 = arith.constant 0 : i32
    %c0_i32_1 = arith.constant 0 : i32
    return %arg1, %c0_i32, %c0_i32_0 : i32, i32, i32
  }
  func.func @transform_8(%arg0: i32, %arg1: i32) -> (i32, i32, i32) {
    %c0_i32 = arith.constant 0 : i32
    %c0_i32_0 = arith.constant 0 : i32
    %c0_i32_1 = arith.constant 0 : i32
    return %arg1, %c0_i32, %c0_i32_0 : i32, i32, i32
  }
  func.func @transform_9(%arg0: i32, %arg1: i32) -> (i32, i32, i32) {
    %c0_i32 = arith.constant 0 : i32
    %c0_i32_0 = arith.constant 0 : i32
    %c0_i32_1 = arith.constant 0 : i32
    return %arg1, %c0_i32, %c0_i32_0 : i32, i32, i32
  }
  func.func @transform_10(%arg0: i32, %arg1: i32) -> (i32, i32, i32) {
    %c0_i32 = arith.constant 0 : i32
    %c0_i32_0 = arith.constant 0 : i32
    %c0_i32_1 = arith.constant 0 : i32
    return %arg1, %c0_i32, %c0_i32_0 : i32, i32, i32
  }
  func.func @transform_11(%arg0: i32, %arg1: i32) -> (i32, i32, i32) {
    %c0_i32 = arith.constant 0 : i32
    %c0_i32_0 = arith.constant 0 : i32
    %c0_i32_1 = arith.constant 0 : i32
    return %arg1, %c0_i32, %c0_i32_0 : i32, i32, i32
  }
  func.func @transform_12(%arg0: i32, %arg1: i32) -> (i32, i32, i32) {
    %c0_i32 = arith.constant 0 : i32
    %c0_i32_0 = arith.constant 0 : i32
    %c0_i32_1 = arith.constant 0 : i32
    return %arg1, %c0_i32, %c0_i32_0 : i32, i32, i32
  }
  func.func @transform_13(%arg0: i32, %arg1: i32) -> (i32, i32, i32) {
    %c0_i32 = arith.constant 0 : i32
    %c0_i32_0 = arith.constant 0 : i32
    %c0_i32_1 = arith.constant 0 : i32
    return %arg0, %c0_i32, %c0_i32_0 : i32, i32, i32
  }
}

</mosaic_0001>

<bundles_post_ra>
// kernel: tpu_custom_call.1
= control target key start
LH: loop header
LB: loop body
LE: loop exit
PB: predicated region body
PF: predicated region fallthrough
CT: control target
= control target key end

     0   :  { %s5650_s0 = inlined_call_operand.vmem [shape: f32[4,8,32], index: 0, kind: input, shape index: {}]   ;;  %s5651_s1 = inlined_call_operand.vmem [shape: f32[2,1,32], index: 1, kind: input, shape index: {}]   ;;  %s5652_s2 = inlined_call_operand.vmem [shape: f32[2,1,32], index: 2, kind: input, shape index: {}]   ;;  %s5653_s3 = inlined_call_operand.vmem [shape: f32[2,32,96], index: 3, kind: input, shape index: {}]   ;;  %s5654_s4 = inlined_call_operand.vmem [shape: f32[2,1,96], index: 4, kind: input, shape index: {}]   ;;  %s5655_s5 = inlined_call_operand.vmem [shape: f32[2,32,32], index: 5, kind: input, shape index: {}]   ;;  %s5656_s6 = inlined_call_operand.vmem [shape: f32[2,1,32], index: 6, kind: input, shape index: {}]   ;;  %s5657_s7 = inlined_call_operand.vmem [shape: f32[2,1,32], index: 7, kind: input, shape index: {}]   ;;  %s5658_s8 = inlined_call_operand.vmem [shape: f32[2,1,32], index: 8, kind: input, shape index: {}]   ;;  %s5659_s9 = inlined_call_operand.vmem [shape: f32[2,32,128], index: 9, kind: input, shape index: {}]   ;;  %s5660_s10 = inlined_call_operand.vmem [shape: f32[2,1,128], index: 10, kind: input, shape index: {}]   ;;  %s5661_s11 = inlined_call_operand.vmem [shape: f32[2,128,32], index: 11, kind: input, shape index: {}]   ;;  %s5662_s12 = inlined_call_operand.vmem [shape: f32[2,1,32], index: 12, kind: input, shape index: {}]   ;;  %s5663_s13 = inlined_call_operand.hbm [shape: f32[4,8,32], index: 13, kind: output, shape index: {}]  }
   0x1   :  { %5668 = sst [smem:[#allocation11_spill]] %s5653_s3 }
   0x2   :  { %5669 = sst [smem:[#allocation12_spill]] %s5655_s5 }
   0x3   :  { %5670 = sst [smem:[#allocation13_spill]] %s5663_s13 }
   0x4   :  { %18 = vsyncpa [#allocation5], 0  ;;  %s5019_s25 = smov 0   ;;  %s5021_s26 = smov 0  }
   0x5   :  { %s5023_s27 = smov 0  }
   0x6 LB: > { %5671 = sst [smem:[#allocation7_spill]] %s4925_s26  ;;  %s33_s29 = sadd.s32 1, %s4925_s26  ;;  %s4929_s27 = sphi %s5023_s27, %s24_s27   ;;  %s4925_s26 = sphi %s5021_s26, %s5690_s26   ;;  %s4921_s25 = sphi %s5019_s25, %s5689_s25  }
   0x7   : > { %5672 = sst [smem:[#allocation8_spill]] %s4929_s27  ;;  %p34_p0 = scmp.ge.s32.totalorder %s33_s29, 2 }
   0x8   : > { %p4234_p1 = scmp.ge.s32.totalorder %s4929_s27, 1  ;;  %p505_p2 = scmp.lt.s32.totalorder %s4929_s27, 3 }
   0x9   : > { %s5692_s29 = smov (%p34_p0, %s33_s29), 0 }
   0xa   : > { %5673 = sst [smem:[#allocation9_spill]] %s5692_s29  ;;  %p506_p3 = pnand %p4234_p1, %p505_p2 }
   0xc   : > { %509 = sbr.rel (%p506_p3) target bundleno = 3589 (0xe05), region = 72 }
  0x13   : > { %p594_p4 = scmp.lt.s32.totalorder %s4921_s25, 1  ;;  %s5674_s3 = sld [smem:[#allocation11_spill]] }
  0x14   : > { %s5675_s5 = sld [smem:[#allocation12_spill]]  ;;  %p4243_p5 = scmp.ne.s32.totalorder %s4921_s25, 0 }
  0x15   : > { %s5042_s30 = scalar_select %p594_p4, %s4921_s25, 1 }
  0x16   : > { %642 = sbr.rel (%p4243_p5) target bundleno = 29 (0x1d), region = 76  ;;  %v643_v0 = vld [vmem:[%s5650_s0] sm:$0xff] (!%p4243_p5)  ;;  %vm647_vm0 = vcmask (!%p4243_p5), 261120   ;;  %v644_v1 = vld [vmem:[%s5650_s0 + $0x8] sm:$0xff] (!%p4243_p5)  ;;  %v645_v2 = vld [vmem:[%s5650_s0 + $0x10] sm:$0xff] (!%p4243_p5) }
  0x17   : > { %s4321_s20 = sshll.u32 %s5042_s30, 5  ;;  %s618_s27 = scalar_lea.vmem %s5657_s7, %s5042_s30  ;;  %648 = vst.msk [vmem:[#allocation2] sm:$0xff] (!%p4243_p5), %vm647_vm0, %v643_v0  ;;  %649 = vst.msk [vmem:[#allocation2 + $0x8] sm:$0xff] (!%p4243_p5), %vm647_vm0, %v644_v1  ;;  %v646_v3 = vld [vmem:[%s5650_s0 + $0x18] sm:$0xff] (!%p4243_p5) }
  0x18   : > { %s621_s23 = scalar_lea.vmem %s5658_s8, %s5042_s30  ;;  %s637_s21 = scalar_lea.vmem %s5662_s12, %s5042_s30  ;;  %650 = vst.msk [vmem:[#allocation2 + $0x10] sm:$0xff] (!%p4243_p5), %vm647_vm0, %v645_v2  ;;  %651 = vst.msk [vmem:[#allocation2 + $0x18] sm:$0xff] (!%p4243_p5), %vm647_vm0, %v646_v3 }
  0x19   : > { %s5060_s15 = scalar_lea.vmem %s5674_s3, %s4321_s20  ;;  %s5082_s3 = scalar_lea.vmem %s5659_s9, %s4321_s20 }
  0x1a   : > { %s5065_s26 = scalar_lea.vmem %s5675_s5, %s4321_s20  ;;  %s629_s5 = scalar_lea.vmem %s5660_s10, %s5042_s30 }
  0x1b   : > { %5676 = sst [smem:[#allocation10_spill]] %s5065_s26  ;;  %s4324_s26 = sshll.u32 %s5042_s30, 7 }
  0x1c   : > { %s5092_s17 = scalar_lea.vmem %s5661_s11, %s4324_s26 }
  0x1d PF: > { %vm658_vm1 = vcmask 261120   ;;  %v732_v32 = vld [vmem:[%s5060_s15] sm:$0xff]  ;;  %v733_v33 = vld [vmem:[%s5060_s15 + $0x8] sm:$0xff]  ;;  %v734_v34 = vld [vmem:[%s5060_s15 + $0x10] sm:$0xff]  ;;  %s5677_s19 = scalar_lea.vmem %s5651_s1, %s5042_s30  ;;  %s5678_s20 = scalar_lea.vmem %s5652_s2, %s5042_s30  ;;  %vm4932_vm2 = vmmov 0   ;;  %vm848_vm3 = vcmask 64512  }
  0x1e   : > { %v652_v4 = vld [vmem:[#allocation2] sm:$0xff]  ;;  %v653_v6 = vld [vmem:[#allocation2 + $0x8] sm:$0xff]  ;;  %v4673_v35 = vpack.c.bf16 %v733_v33, %v732_v32  ;;  %v735_v36 = vld [vmem:[%s5060_s15 + $0x18] sm:$0xff]  ;;  %s5679_s28 = scalar_lea.vmem %s5654_s4, %s5042_s30  ;;  %s4933_s29 = smov 96   ;;  %vm2200_vm5 = vcmask 130112   ;;  %vm2889_vm6 = vcmask 195712  }
  0x1f   : > { %v654_v5 = vld [vmem:[#allocation2 + $0x10] sm:$0xff]  ;;  %v659_v7 = vsel %vm658_vm1, %v652_v4, 0.0  ;;  %v655_v9 = vld [vmem:[#allocation2 + $0x18] sm:$0xff]  ;;  %v662_v10 = vsel %vm658_vm1, %v653_v6, 0.0  ;;  %v4677_v37 = vpack.c.bf16 %v735_v36, %v734_v34  ;;  %v4244_v51 = vld [vmem:[%s5677_s19] ss:$0 sm:$0xff] }
  0x20   : > { %v665_v8 = vsel %vm658_vm1, %v654_v5, 0.0  ;;  %660 = vadd.xlane.f32.xlu0 %v659_v7  ;;  %v668_v11 = vsel %vm658_vm1, %v655_v9, 0.0  ;;  %4674 = vmatprep.subr.bf16.mxu0 %v4673_v35  ;;  %v4245_v53 = vld [vmem:[%s5678_s20] ss:$0 sm:$0xff]  ;;  %s4934_s26 = smov 64   ;;  %s4935_s13 = smov 88  }
  0x21   : > { %666 = vadd.xlane.f32.xlu1 %v665_v8  ;;  %4676 = vmatpush3.bf16.msra.mxu0 %v4673_v35  ;;  %s4936_s15 = smov 120   ;;  %s4937_s16 = smov 56   ;;  %vm3578_vm7 = vcmask 261312  }
  0x22   : > { %4678 = vmatprep.subr.bf16.mxu0 %v4677_v37  ;;  %s4938_s19 = smov 80   ;;  %s4939_s18 = smov 112  }
  0x23   : > { %s4940_s22 = smov 48   ;;  %s4941_s20 = smov 72  }
  0x24   : > { %663 = vadd.xlane.f32.xlu0 %v662_v10  ;;  %s4942_s24 = smov 104   ;;  %s4943_s14 = smov 40  }
  0x25   : > { %669 = vadd.xlane.f32.xlu1 %v668_v11  ;;  %4680 = vmatpush3.bf16.msra.mxu0 %v4677_v37  ;;  %p4316_p6 = scmp.ne.s32.totalorder %s4921_s25, 1 }
  0xad   : > { %v661_v12 = vpop.xlane.xlu0 %660 }
  0xae   : > { %v667_v13 = vpop.xlane.xlu1 %666  ;;  %v672_v14 = vmul.f32 0.03125, %v661_v12 }
  0xaf   : > { %v674_v15 = vmul.f32 0.03125, %v667_v13 }
  0xb0   : > { %v676_v16 = vsub.f32 %v652_v4, %v672_v14  ;;  %v4931_v4 = vmov 0.0  }
  0xb1   : > { %v678_v17 = vsub.f32 %v654_v5, %v674_v15  ;;  %v664_v18 = vpop.xlane.xlu0 %663  ;;  %4452 = vmatprep.subr.mxu1 %v4931_v4  ;;  %4447 = vmatprep.subr.mxu0 %v4931_v4  ;;  %v4246_v5 = vld [vmem:[%s5679_s28] ss:$0 sm:$0xff]  ;;  %s4944_s28 = smov 8  }
  0xb2   : > { %v670_v19 = vpop.xlane.xlu1 %669  ;;  %v673_v20 = vmul.f32 0.03125, %v664_v18  ;;  %v680_v22 = vmul.f32 %v676_v16, %v676_v16  ;;  %4454 = vmatprep.mubr.msk.f32.mxu1 %vm4932_vm2, %v4931_v4 }
  0xb3   : > { %v675_v21 = vmul.f32 0.03125, %v670_v19  ;;  %v682_v23 = vmul.f32 %v678_v17, %v678_v17 }
  0xb4   : > { %v677_v24 = vsub.f32 %v653_v6, %v673_v20  ;;  %v684_v26 = vsel %vm658_vm1, %v680_v22, 0.0  ;;  %v840_v20 = vlaneseq }
  0xb5   : > { %v679_v25 = vsub.f32 %v655_v9, %v675_v21  ;;  %685 = vadd.xlane.f32.xlu0 %v684_v26  ;;  %v690_v27 = vsel %vm658_vm1, %v682_v23, 0.0 }
  0xb6   : > { %v681_v28 = vmul.f32 %v677_v24, %v677_v24  ;;  %v841_v21 = vshrl.u32 %v840_v20, 7  ;;  %v843_v22 = vand.u32 127, %v840_v20 }
  0xb7   : > { %v683_v29 = vmul.f32 %v679_v25, %v679_v25 }
  0xb8   : > { %v687_v30 = vsel %vm658_vm1, %v681_v28, 0.0  ;;  %vm5192_vm4 = vcmp.le.s32.totalorder %v843_v22, %v841_v21 }
  0xb9   : > { %691 = vadd.xlane.f32.xlu0 %v690_v27  ;;  %688 = vadd.xlane.f32.xlu1 %v687_v30  ;;  %v693_v31 = vsel %vm658_vm1, %v683_v29, 0.0 }
  0xbd   : > { %694 = vadd.xlane.f32.xlu1 %v693_v31 }
 0x142   : > { %v686_v38 = vpop.xlane.xlu0 %685 }
 0x143   : > { %v696_v39 = vmul.f32 0.03125, %v686_v38 }
 0x145   : > { %v700_v40 = vadd.f32 1e-05, %v696_v39 }
 0x146   : > { %v689_v41 = vpop.xlane.xlu1 %688  ;;  %v692_v42 = vpop.xlane.xlu0 %691 }
 0x147   : > { %4777 = vrsqrt.f32 %v700_v40  ;;  %v697_v43 = vmul.f32 0.03125, %v689_v41  ;;  %v698_v44 = vmul.f32 0.03125, %v692_v42 }
 0x149   : > { %v701_v45 = vadd.f32 1e-05, %v697_v43  ;;  %v702_v46 = vadd.f32 1e-05, %v698_v44 }
 0x14a   : > { %v695_v47 = vpop.xlane.xlu1 %694 }
 0x14b   : > { %4779 = vrsqrt.f32 %v701_v45  ;;  %v699_v48 = vmul.f32 0.03125, %v695_v47 }
 0x14c   : > { %4781 = vrsqrt.f32 %v702_v46 }
 0x14d   : > { %v703_v49 = vadd.f32 1e-05, %v699_v48 }
 0x14f   : > { %4783 = vrsqrt.f32 %v703_v49 }
 0x151   : > { %v4778_v50 = vpop.eup %4777 }
 0x152   : > { %v708_v52 = vmul.f32 %v4778_v50, %v676_v16 }
 0x154   : > { %v718_v54 = vmul.f32 %v4244_v51, %v708_v52 }
 0x155   : > { %v4780_v55 = vpop.eup %4779 }
 0x156   : > { %v4782_v56 = vpop.eup %4781  ;;  %v728_v57 = vadd.f32 %v4245_v53, %v718_v54  ;;  %v709_v58 = vmul.f32 %v4780_v55, %v677_v24 }
 0x157   : > { %v710_v59 = vmul.f32 %v4782_v56, %v678_v17 }
 0x158   : > { %4441 = vmatprep.mubr.msk.f32.mxu0 %vm658_vm1, %v728_v57  ;;  %v719_v60 = vmul.f32 %v4244_v51, %v709_v58 }
 0x159   : > { %v4784_v61 = vpop.eup %4783  ;;  %v720_v62 = vmul.f32 %v4244_v51, %v710_v59 }
 0x15a   : > { %v729_v63 = vadd.f32 %v4245_v53, %v719_v60  ;;  %v711_v0 = vmul.f32 %v4784_v61, %v679_v25 }
 0x15b   : > { %v730_v1 = vadd.f32 %v4245_v53, %v720_v62 }
 0x15c   : > { %4442 = vmatmul.mubr.msk.f32.vlgmr.msra.gmra.mrb[0].mxu0 %vm658_vm1, %v729_v63  ;;  %v721_v2 = vmul.f32 %v4244_v51, %v711_v0 }
 0x15d   : > { %4444 = vmatprep.mubr.msk.f32.mxu0 %vm658_vm1, %v730_v1 }
 0x15e   : > { %v731_v3 = vadd.f32 %v4245_v53, %v721_v2 }
 0x160   : > { %4445 = vmatmul.mubr.msk.f32.gmra.mrb[2].mxu0 %vm658_vm1, %v731_v3 }
 0x161   : > { %4449 = vmatprep.mubr.msk.f32.mxu0 %vm4932_vm2, %v4931_v4 }
 0x22f   : > { %v4443_v6 = vpop.f32.mrb[0].mxu0 }
 0x230   : > { %v5148_v7 = vadd.f32 %v4443_v6, %v4246_v5  ;;  %v821_v8 = vpop.f32.mrb[1].mxu0 }
 0x231   : > { %v5150_v9 = vadd.f32 %v4246_v5, %v821_v8 }
 0x232   : > { %924 = vrot.lane.b32.xlu1 %v5148_v7, %s4933_s29 }
 0x233   : > { %846 = vrot.lane.b32.xlu0 %v5150_v9, %s4933_s29  ;;  %v4446_v10 = vpop.f32.mrb[2].mxu0 }
 0x234   : > { %v831_v11 = vpop.f32.mrb[3].mxu0  ;;  %v5158_v13 = vadd.f32 %v4446_v10, %v4246_v5 }
 0x235   : > { %v5154_v12 = vadd.f32 %v4246_v5, %v831_v11 }
 0x237   : > { %1200 = vrot.lane.b32.xlu0 %v5150_v9, %s4934_s26  ;;  %1001 = vrot.lane.b32.xlu1 %v5154_v12, %s4933_s29 }
 0x23b   : > { %1518 = vrot.lane.b32.xlu0 %v5150_v9, %s4935_s13  ;;  %1078 = vrot.lane.b32.xlu1 %v5158_v13, %s4933_s29  ;;  %s4945_s29 = smov 16  }
 0x23f   : > { %1276 = vrot.lane.b32.xlu1 %v5148_v7, %s4934_s26 }
 0x243   : > { %1428 = vrot.lane.b32.xlu1 %v5158_v13, %s4934_s26 }
 0x247   : > { %1352 = vrot.lane.b32.xlu1 %v5154_v12, %s4934_s26  ;;  %s5682_s26 = sld [smem:[#allocation10_spill]] }
 0x2a4   : > { %v925_v14 = vpop.permute.xlu1 %924 }
 0x2a5   : > { %4453 = vmatpush3.xpose.msk.msra.mxu1 %vm848_vm3, %v925_v14  ;;  %v847_v15 = vpop.permute.xlu0 %846 }
 0x2a6   : > { %4448 = vmatpush3.xpose.msk.msra.mxu0 %vm848_vm3, %v847_v15  ;;  %4457 = vmatprep.subr.mxu1 %v4931_v4 }
 0x2a7   : > { %4462 = vmatprep.subr.mxu0 %v4931_v4 }
 0x2a8   : > { %4455 = vmatmul.mubr.msk.f32.vlgmr.msra.gmra.mrb[0].mxu1 %vm848_vm3, %v5148_v7 }
 0x2a9   : > { %v1002_v16 = vpop.permute.xlu1 %1001  ;;  %4450 = vmatmul.mubr.msk.f32.vlgmr.msra.gmra.mrb[4].mxu0 %vm848_vm3, %v5150_v9  ;;  %4459 = vmatprep.mubr.msk.f32.mxu1 %vm4932_vm2, %v4931_v4  ;;  %v1201_v17 = vpop.permute.xlu0 %1200 }
 0x2aa   : > { %4458 = vmatpush3.xpose.msk.msra.mxu1 %vm848_vm3, %v1002_v16  ;;  %4464 = vmatprep.mubr.msk.f32.mxu0 %vm4932_vm2, %v4931_v4 }
 0x2ab   : > { %4467 = vmatprep.subr.mxu1 %v4931_v4 }
 0x2ad   : > { %4460 = vmatmul.mubr.msk.f32.vlgmr.msra.gmra.mrb[2].mxu1 %vm848_vm3, %v5154_v12  ;;  %v1079_v18 = vpop.permute.xlu1 %1078  ;;  %v1519_v46 = vpop.permute.xlu0 %1518 }
 0x2ae   : > { %4463 = vmatpush3.xpose.msk.msra.mxu0 %vm848_vm3, %v1079_v18  ;;  %4468 = vmatpush3.msra.mxu1 %v1201_v17 }
 0x2af   : > { %4472 = vmatprep.subr.mxu0 %v4931_v4  ;;  %4469 = vmatprep.mubr.msk.f32.mxu1 %vm4932_vm2, %v4931_v4 }
 0x2b0   : > { %4477 = vmatprep.subr.mxu1 %v4931_v4 }
 0x2b1   : > { %v1277_v19 = vpop.permute.xlu1 %1276  ;;  %4465 = vmatmul.mubr.msk.f32.vlgmr.msra.gmra.mrb[6].mxu0 %vm848_vm3, %v5158_v13 }
 0x2b2   : > { %4473 = vmatpush3.msra.mxu0 %v1277_v19  ;;  %4474 = vmatprep.mubr.msk.f32.mxu0 %vm4932_vm2, %v4931_v4 }
 0x2b3   : > { %4482 = vmatprep.subr.mxu0 %v4931_v4 }
 0x2b5   : > { %v1429_v44 = vpop.permute.xlu1 %1428 }
 0x2b9   : > { %v1353_v45 = vpop.permute.xlu1 %1352 }
 0x37b   : > { %v996_v23 = vpop.f32.mrb[0].mxu1 }
 0x37c   : > { %v1155_v25 = vmul.f32 0.35355338, %v996_v23  ;;  %v919_v26 = vpop.f32.mrb[4].mxu0  ;;  %v4456_v27 = vpop.f32.mrb[1].mxu1 }
 0x37d   : > { %v1154_v28 = vmul.f32 0.35355338, %v919_v26  ;;  %v4451_v29 = vpop.f32.mrb[5].mxu0 }
 0x37e   : > { %v1161_v30 = vsel %vm5192_vm4, %v1155_v25, -1e+30 }
 0x37f   : > { %v1167_v31 = vsel %vm848_vm3, %v1161_v30, -inf  ;;  %v1160_v32 = vsel %vm5192_vm4, %v1154_v28, -1e+30 }
 0x380   : > { %1168 = vmax.xlane.f32.xlu1 %v1167_v31  ;;  %v1073_v33 = vpop.f32.mrb[2].mxu1  ;;  %v1164_v34 = vsel %vm848_vm3, %v1160_v32, -inf }
 0x381   : > { %v1156_v35 = vmul.f32 0.35355338, %v1073_v33  ;;  %v4461_v36 = vpop.f32.mrb[3].mxu1  ;;  %1165 = vmax.xlane.f32.xlu0 %v1164_v34 }
 0x383   : > { %v1162_v37 = vsel %vm5192_vm4, %v1156_v35, -1e+30 }
 0x384   : > { %v1150_v38 = vpop.f32.mrb[6].mxu0  ;;  %v1170_v39 = vsel %vm848_vm3, %v1162_v37, -inf }
 0x385   : > { %v1157_v40 = vmul.f32 0.35355338, %v1150_v38  ;;  %1171 = vmax.xlane.f32.xlu0 %v1170_v39  ;;  %v4466_v41 = vpop.f32.mrb[7].mxu0 }
 0x387   : > { %v1163_v42 = vsel %vm5192_vm4, %v1157_v40, -1e+30 }
 0x388   : > { %v1173_v43 = vsel %vm848_vm3, %v1163_v42, -inf }
 0x389   : > { %1174 = vmax.xlane.f32.xlu0 %v1173_v43 }
 0x391   : > { %1596 = vrot.lane.b32.xlu1 %v5148_v7, %s4935_s13 }
 0x395   : > { %1594 = vrot.lane.b32.xlu1 %v5148_v7, %s4936_s15 }
 0x399   : > { %1752 = vrot.lane.b32.xlu1 %v5158_v13, %s4935_s13 }
 0x39d   : > { %1750 = vrot.lane.b32.xlu1 %v5158_v13, %s4936_s15 }
 0x39f   : > { %1516 = vrot.lane.b32.xlu0 %v5150_v9, %s4936_s15 }
 0x3a1   : > { %1948 = vrot.lane.b32.xlu1 %v5148_v7, %s4937_s16 }
 0x3a3   : > { %1674 = vrot.lane.b32.xlu0 %v5154_v12, %s4935_s13  ;;  %s4946_s13 = smov 24  }
 0x3a5   : > { %2024 = vrot.lane.b32.xlu1 %v5154_v12, %s4937_s16 }
 0x3a7   : > { %1672 = vrot.lane.b32.xlu0 %v5154_v12, %s4936_s15 }
 0x3a9   : > { %2100 = vrot.lane.b32.xlu1 %v5158_v13, %s4937_s16 }
 0x3ab   : > { %1872 = vrot.lane.b32.xlu0 %v5150_v9, %s4937_s16 }
 0x3af   : > { %2207 = vrot.lane.b32.xlu0 %v5150_v9, %s4938_s19 }
 0x40d   : > { %v1169_v47 = vpop.xlane.xlu1 %1168 }
 0x40e   : > { %v1177_v48 = vsub.f32 %v1161_v30, %v1169_v47  ;;  %v1166_v49 = vpop.xlane.xlu0 %1165 }
 0x40f   : > { %v1176_v50 = vsub.f32 %v1160_v32, %v1166_v49 }
 0x410   : > { %v1182_v51 = vmul.f32 1.442695, %v1177_v48 }
 0x411   : > { %v1180_v52 = vmul.f32 1.442695, %v1176_v50  ;;  %v1597_v56 = vpop.permute.xlu1 %1596 }
 0x412   : > { %4785 = vpow2.f32 %v1182_v51  ;;  %v1172_v53 = vpop.xlane.xlu0 %1171 }
 0x413   : > { %4787 = vpow2.f32 %v1180_v52  ;;  %v1178_v54 = vsub.f32 %v1162_v37, %v1172_v53 }
 0x415   : > { %v1184_v55 = vmul.f32 1.442695, %v1178_v54  ;;  %v1595_v62 = vpop.permute.xlu1 %1594 }
 0x416   : > { %v1175_v57 = vpop.xlane.xlu0 %1174 }
 0x417   : > { %4789 = vpow2.f32 %v1184_v55  ;;  %v1179_v58 = vsub.f32 %v1163_v42, %v1175_v57 }
 0x419   : > { %v1186_v59 = vmul.f32 1.442695, %v1179_v58  ;;  %v1753_v2 = vpop.permute.xlu1 %1752 }
 0x41a   : > { %v1517_v60 = vpop.permute.xlu0 %1516 }
 0x41b   : > { %4791 = vpow2.f32 %v1186_v59 }
 0x41c   : > { %v5224_v61 = vpop.eup %4785 }
 0x41d   : > { %v5226_v63 = vpop.eup %4787  ;;  %4475 = vmatmul.mubr.msk.f32.vlgmr.msra.gmra.mrb[8].mxu0 %vm848_vm3, %v5224_v61  ;;  %v1751_v6 = vpop.permute.xlu1 %1750 }
 0x41e   : > { %4483 = vmatpush3.msra.mxu0 %v1429_v44  ;;  %4470 = vmatmul.mubr.msk.f32.vlgmr.msra.gmra.mrb[4].mxu1 %vm848_vm3, %v5226_v63  ;;  %v1675_v1 = vpop.permute.xlu0 %1674 }
 0x41f   : > { %4478 = vmatpush3.msra.mxu1 %v1353_v45  ;;  %4479 = vmatprep.mubr.msk.f32.mxu1 %vm4932_vm2, %v4931_v4 }
 0x420   : > { %4487 = vmatprep.subr.mxu1 %v4931_v4  ;;  %4484 = vmatprep.mubr.msk.f32.mxu0 %vm4932_vm2, %v4931_v4 }
 0x421   : > { %v5237_v0 = vpop.eup %4789  ;;  %4492 = vmatprep.subr.mxu0 %v4931_v4  ;;  %v1949_v10 = vpop.permute.xlu1 %1948 }
 0x422   : > { %4480 = vmatmul.mubr.msk.f32.vlgmr.msra.gmra.mrb[6].mxu1 %vm848_vm3, %v5237_v0  ;;  %v1673_v5 = vpop.permute.xlu0 %1672 }
 0x423   : > { %4489 = vmatprep.mubr.msk.f32.mxu1 %vm4932_vm2, %v4931_v4 }
 0x425   : > { %v5244_v3 = vpop.eup %4791  ;;  %v2025_v42 = vpop.permute.xlu1 %2024 }
 0x426   : > { %4488 = vmatpush3.xpose.msk.msra.mxu1 %vm848_vm3, %v1519_v46  ;;  %4485 = vmatmul.mubr.msk.f32.vlgmr.msra.gmra.mrb[10].mxu0 %vm848_vm3, %v5244_v3  ;;  %v1873_v8 = vpop.permute.xlu0 %1872 }
 0x427   : > { %4493 = vmatpush3.xpose.msk.msra.mxu0 %vm848_vm3, %v1597_v56  ;;  %4497 = vmatprep.subr.mxu1 %v4931_v4 }
 0x428   : > { %4494 = vmatprep.mubr.msk.f32.mxu0 %vm4932_vm2, %v4931_v4  ;;  %4502 = vmatprep.subr.mxu0 %v4931_v4 }
 0x429   : > { %4490 = vmatmul.mubr.msk.f32.vlgmr.msra.gmra.mrb[8].mxu1 %vm848_vm3, %v1517_v60  ;;  %v2101_v44 = vpop.permute.xlu1 %2100 }
 0x42a   : > { %4498 = vmatpush3.xpose.msk.msra.mxu1 %vm848_vm3, %v1675_v1  ;;  %4495 = vmatmul.mubr.msk.f32.vlgmr.msra.gmra.mrb[12].mxu0 %vm848_vm3, %v1595_v62  ;;  %v2208_v43 = vpop.permute.xlu0 %2207 }
 0x42b   : > { %4503 = vmatpush3.xpose.msk.msra.mxu0 %vm848_vm3, %v1753_v2  ;;  %4499 = vmatprep.mubr.msk.f32.mxu1 %vm4932_vm2, %v4931_v4 }
 0x42c   : > { %4507 = vmatprep.subr.mxu1 %v4931_v4  ;;  %4504 = vmatprep.mubr.msk.f32.mxu0 %vm4932_vm2, %v4931_v4 }
 0x42d   : > { %4500 = vmatmul.mubr.msk.f32.vlgmr.msra.gmra.mrb[10].mxu1 %vm848_vm3, %v1673_v5  ;;  %4512 = vmatprep.subr.mxu0 %v4931_v4 }
 0x42e   : > { %4508 = vmatpush3.msra.mxu1 %v1873_v8  ;;  %4505 = vmatmul.mubr.msk.f32.vlgmr.msra.gmra.mrb[14].mxu0 %vm848_vm3, %v1751_v6 }
 0x42f   : > { %4513 = vmatpush3.msra.mxu0 %v1949_v10  ;;  %4509 = vmatprep.mubr.msk.f32.mxu1 %vm4932_vm2, %v4931_v4 }
 0x430   : > { %4517 = vmatprep.subr.mxu1 %v4931_v4  ;;  %4514 = vmatprep.mubr.msk.f32.mxu0 %vm4932_vm2, %v4931_v4 }
 0x431   : > { %4522 = vmatprep.subr.mxu0 %v4931_v4 }
 0x4f0   : > { %v5272_v11 = vpop.f32.mrb[8].mxu0 }
 0x4f1   : > { %v5274_v14 = vpop.f32.mrb[4].mxu1  ;;  %v4476_v15 = vpop.f32.mrb[9].mxu0 }
 0x4f2   : > { %v4471_v16 = vpop.f32.mrb[5].mxu1 }
 0x4f5   : > { %v5276_v17 = vpop.f32.mrb[6].mxu1 }
 0x4f6   : > { %v4481_v18 = vpop.f32.mrb[7].mxu1 }
 0x4f9   : > { %v5278_v19 = vpop.f32.mrb[10].mxu0 }
 0x4fa   : > { %v4486_v20 = vpop.f32.mrb[11].mxu0 }
 0x4fc   : > { %v1590_v21 = vpop.f32.mrb[8].mxu1 }
 0x4fd   : > { %v1828_v22 = vmul.f32 0.35355338, %v1590_v21  ;;  %v4491_v23 = vpop.f32.mrb[9].mxu1  ;;  %v1668_v25 = vpop.f32.mrb[12].mxu0 }
 0x4fe   : > { %v1829_v26 = vmul.f32 0.35355338, %v1668_v25  ;;  %v4496_v27 = vpop.f32.mrb[13].mxu0 }
 0x4ff   : > { %v1832_v28 = vsel %vm5192_vm4, %v1828_v22, -1e+30 }
 0x500   : > { %v1746_v29 = vpop.f32.mrb[10].mxu1  ;;  %v1836_v30 = vsel %vm848_vm3, %v1832_v28, -inf  ;;  %v1833_v31 = vsel %vm5192_vm4, %v1829_v26, -1e+30 }
 0x501   : > { %1837 = vmax.xlane.f32.xlu0 %v1836_v30  ;;  %v4501_v32 = vpop.f32.mrb[11].mxu1  ;;  %v1824_v33 = vpop.f32.mrb[14].mxu0  ;;  %v1839_v34 = vsel %vm848_vm3, %v1833_v31, -inf  ;;  %v1830_v35 = vmul.f32 0.35355338, %v1746_v29 }
 0x502   : > { %v1831_v36 = vmul.f32 0.35355338, %v1824_v33  ;;  %1840 = vmax.xlane.f32.xlu1 %v1839_v34  ;;  %v4506_v37 = vpop.f32.mrb[15].mxu0 }
 0x503   : > { %v1834_v40 = vsel %vm5192_vm4, %v1830_v35, -1e+30 }
 0x504   : > { %v1835_v38 = vsel %vm5192_vm4, %v1831_v36, -1e+30  ;;  %v1842_v41 = vsel %vm848_vm3, %v1834_v40, -inf }
 0x505   : > { %v1845_v39 = vsel %vm848_vm3, %v1835_v38, -inf }
 0x506   : > { %1846 = vmax.xlane.f32.xlu0 %v1845_v39 }
 0x50a   : > { %1843 = vmax.xlane.f32.xlu0 %v1842_v41 }
 0x513   : > { %2285 = vrot.lane.b32.xlu1 %v5148_v7, %s4938_s19 }
 0x517   : > { %2283 = vrot.lane.b32.xlu1 %v5148_v7, %s4939_s18 }
 0x51b   : > { %2441 = vrot.lane.b32.xlu1 %v5158_v13, %s4938_s19 }
 0x51f   : > { %2439 = vrot.lane.b32.xlu1 %v5158_v13, %s4939_s18 }
 0x520   : > { %2205 = vrot.lane.b32.xlu0 %v5150_v9, %s4939_s18 }
 0x523   : > { %2637 = vrot.lane.b32.xlu1 %v5148_v7, %s4940_s22 }
 0x524   : > { %2363 = vrot.lane.b32.xlu0 %v5154_v12, %s4938_s19  ;;  %s5683_s19 = scalar_lea.vmem %s5656_s6, %s5042_s30 }
 0x527   : > { %2713 = vrot.lane.b32.xlu1 %v5154_v12, %s4940_s22 }
 0x528   : > { %2361 = vrot.lane.b32.xlu0 %v5154_v12, %s4939_s18 }
 0x52b   : > { %2789 = vrot.lane.b32.xlu1 %v5158_v13, %s4940_s22 }
 0x52c   : > { %2561 = vrot.lane.b32.xlu0 %v5150_v9, %s4940_s22 }
 0x52f   : > { %2974 = vrot.lane.b32.xlu1 %v5148_v7, %s4941_s20 }
 0x530   : > { %2896 = vrot.lane.b32.xlu0 %v5150_v9, %s4941_s20 }
 0x58e   : > { %v1838_v45 = vpop.xlane.xlu0 %1837 }
 0x58f   : > { %v1848_v46 = vsub.f32 %v1832_v28, %v1838_v45  ;;  %v1841_v47 = vpop.xlane.xlu1 %1840 }
 0x590   : > { %v1849_v48 = vsub.f32 %v1833_v31, %v1841_v47 }
 0x591   : > { %v1852_v49 = vmul.f32 1.442695, %v1848_v46 }
 0x592   : > { %v1854_v50 = vmul.f32 1.442695, %v1849_v48 }
 0x593   : > { %4793 = vpow2.f32 %v1852_v49  ;;  %v1847_v51 = vpop.xlane.xlu0 %1846  ;;  %v2286_v53 = vpop.permute.xlu1 %2285 }
 0x594   : > { %4795 = vpow2.f32 %v1854_v50  ;;  %v1851_v52 = vsub.f32 %v1835_v38, %v1847_v51 }
 0x596   : > { %v1858_v54 = vmul.f32 1.442695, %v1851_v52 }
 0x597   : > { %v1844_v55 = vpop.xlane.xlu0 %1843  ;;  %v2284_v58 = vpop.permute.xlu1 %2283 }
 0x598   : > { %4797 = vpow2.f32 %v1858_v54  ;;  %v1850_v56 = vsub.f32 %v1834_v40, %v1844_v55 }
 0x59a   : > { %v1856_v57 = vmul.f32 1.442695, %v1850_v56 }
 0x59b   : > { %v2206_v60 = vpop.permute.xlu0 %2205  ;;  %v2442_v2 = vpop.permute.xlu1 %2441 }
 0x59c   : > { %4799 = vpow2.f32 %v1856_v57 }
 0x59d   : > { %v5310_v59 = vpop.eup %4793 }
 0x59e   : > { %v5312_v62 = vpop.eup %4795  ;;  %4510 = vmatmul.mubr.msk.f32.vlgmr.msra.gmra.mrb[12].mxu1 %vm848_vm3, %v5310_v59  ;;  %v1860_v24 = vsel %vm848_vm3, %v5310_v59, 0.0 }
 0x59f   : > { %4518 = vmatpush3.msra.mxu1 %v2025_v42  ;;  %4515 = vmatmul.mubr.msk.f32.vlgmr.msra.gmra.mrb[16].mxu0 %vm848_vm3, %v5312_v62  ;;  %v2364_v5 = vpop.permute.xlu0 %2363  ;;  %v2440_v8 = vpop.permute.xlu1 %2439 }
 0x5a0   : > { %4523 = vmatpush3.msra.mxu0 %v2101_v44  ;;  %4524 = vmatprep.mubr.msk.f32.mxu0 %vm4932_vm2, %v4931_v4 }
 0x5a1   : > { %4532 = vmatprep.subr.mxu0 %v4931_v4  ;;  %4519 = vmatprep.mubr.msk.f32.mxu1 %vm4932_vm2, %v4931_v4 }
 0x5a2   : > { %v5323_v1 = vpop.eup %4797  ;;  %4527 = vmatprep.subr.mxu1 %v4931_v4 }
 0x5a3   : > { %4525 = vmatmul.mubr.msk.f32.vlgmr.msra.gmra.mrb[18].mxu0 %vm848_vm3, %v5323_v1  ;;  %v2362_v10 = vpop.permute.xlu0 %2361  ;;  %v2638_v15 = vpop.permute.xlu1 %2637 }
 0x5a4   : > { %4534 = vmatprep.mubr.msk.f32.mxu0 %vm4932_vm2, %v4931_v4 }
 0x5a6   : > { %v5330_v6 = vpop.eup %4799 }
 0x5a7   : > { %4533 = vmatpush3.xpose.msk.msra.mxu0 %vm848_vm3, %v2286_v53  ;;  %4520 = vmatmul.mubr.msk.f32.vlgmr.msra.gmra.mrb[14].mxu1 %vm848_vm3, %v5330_v6  ;;  %v2562_v16 = vpop.permute.xlu0 %2561  ;;  %v2714_v48 = vpop.permute.xlu1 %2713 }
 0x5a8   : > { %4528 = vmatpush3.xpose.msk.msra.mxu1 %vm848_vm3, %v2208_v43  ;;  %4542 = vmatprep.subr.mxu0 %v4931_v4 }
 0x5a9   : > { %4529 = vmatprep.mubr.msk.f32.mxu1 %vm4932_vm2, %v4931_v4  ;;  %4537 = vmatprep.subr.mxu1 %v4931_v4 }
 0x5aa   : > { %4535 = vmatmul.mubr.msk.f32.vlgmr.msra.gmra.mrb[20].mxu0 %vm848_vm3, %v2284_v58 }
 0x5ab   : > { %4543 = vmatpush3.xpose.msk.msra.mxu0 %vm848_vm3, %v2442_v2  ;;  %4530 = vmatmul.mubr.msk.f32.vlgmr.msra.gmra.mrb[16].mxu1 %vm848_vm3, %v2206_v60  ;;  %v2790_v49 = vpop.permute.xlu1 %2789  ;;  %v2897_v51 = vpop.permute.xlu0 %2896 }
 0x5ac   : > { %4538 = vmatpush3.xpose.msk.msra.mxu1 %vm848_vm3, %v2364_v5  ;;  %4544 = vmatprep.mubr.msk.f32.mxu0 %vm4932_vm2, %v4931_v4 }
 0x5ad   : > { %4552 = vmatprep.subr.mxu0 %v4931_v4  ;;  %4539 = vmatprep.mubr.msk.f32.mxu1 %vm4932_vm2, %v4931_v4 }
 0x5ae   : > { %4545 = vmatmul.mubr.msk.f32.vlgmr.msra.gmra.mrb[22].mxu0 %vm848_vm3, %v2440_v8  ;;  %4547 = vmatprep.subr.mxu1 %v4931_v4 }
 0x5af   : > { %4553 = vmatpush3.msra.mxu0 %v2638_v15  ;;  %4540 = vmatmul.mubr.msk.f32.vlgmr.msra.gmra.mrb[18].mxu1 %vm848_vm3, %v2362_v10  ;;  %v2975_v50 = vpop.permute.xlu1 %2974 }
 0x5b0   : > { %4548 = vmatpush3.msra.mxu1 %v2562_v16  ;;  %4554 = vmatprep.mubr.msk.f32.mxu0 %vm4932_vm2, %v4931_v4 }
 0x5b1   : > { %4562 = vmatprep.subr.mxu0 %v4931_v4  ;;  %4549 = vmatprep.mubr.msk.f32.mxu1 %vm4932_vm2, %v4931_v4 }
 0x5b2   : > { %4557 = vmatprep.subr.mxu1 %v4931_v4 }
 0x671   : > { %v5358_v18 = vpop.f32.mrb[12].mxu1 }
 0x672   : > { %v4511_v20 = vpop.f32.mrb[13].mxu1  ;;  %v5360_v21 = vpop.f32.mrb[16].mxu0 }
 0x673   : > { %v4516_v22 = vpop.f32.mrb[17].mxu0 }
 0x676   : > { %v5362_v23 = vpop.f32.mrb[18].mxu0 }
 0x677   : > { %v4526_v25 = vpop.f32.mrb[19].mxu0 }
 0x67a   : > { %v5364_v26 = vpop.f32.mrb[14].mxu1 }
 0x67b   : > { %v4521_v27 = vpop.f32.mrb[15].mxu1 }
 0x67d   : > { %v2357_v28 = vpop.f32.mrb[20].mxu0 }
 0x67e   : > { %v2518_v29 = vmul.f32 0.35355338, %v2357_v28  ;;  %v4536_v30 = vpop.f32.mrb[21].mxu0  ;;  %v2279_v31 = vpop.f32.mrb[16].mxu1 }
 0x67f   : > { %v2517_v32 = vmul.f32 0.35355338, %v2279_v31  ;;  %v4531_v33 = vpop.f32.mrb[17].mxu1 }
 0x680   : > { %v2522_v34 = vsel %vm5192_vm4, %v2518_v29, -1e+30 }
 0x681   : > { %v2513_v35 = vpop.f32.mrb[22].mxu0  ;;  %v2528_v36 = vsel %vm848_vm3, %v2522_v34, -inf  ;;  %v2521_v37 = vsel %vm5192_vm4, %v2517_v32, -1e+30 }
 0x682   : > { %v2520_v38 = vmul.f32 0.35355338, %v2513_v35  ;;  %2529 = vmax.xlane.f32.xlu1 %v2528_v36  ;;  %v4546_v39 = vpop.f32.mrb[23].mxu0  ;;  %v2435_v40 = vpop.f32.mrb[18].mxu1  ;;  %v2525_v41 = vsel %vm848_vm3, %v2521_v37, -inf }
 0x683   : > { %v2519_v42 = vmul.f32 0.35355338, %v2435_v40  ;;  %2526 = vmax.xlane.f32.xlu0 %v2525_v41  ;;  %v4541_v43 = vpop.f32.mrb[19].mxu1 }
 0x684   : > { %v2524_v44 = vsel %vm5192_vm4, %v2520_v38, -1e+30 }
 0x685   : > { %v2534_v45 = vsel %vm848_vm3, %v2524_v44, -inf  ;;  %v2523_v46 = vsel %vm5192_vm4, %v2519_v42, -1e+30 }
 0x686   : > { %v2531_v47 = vsel %vm848_vm3, %v2523_v46, -inf }
 0x687   : > { %2535 = vmax.xlane.f32.xlu0 %v2534_v45 }
 0x68b   : > { %2532 = vmax.xlane.f32.xlu0 %v2531_v47 }
 0x693   : > { %2972 = vrot.lane.b32.xlu1 %v5148_v7, %s4942_s24 }
 0x697   : > { %3130 = vrot.lane.b32.xlu1 %v5158_v13, %s4941_s20 }
 0x69b   : > { %3128 = vrot.lane.b32.xlu1 %v5158_v13, %s4942_s24 }
 0x6a1   : > { %2894 = vrot.lane.b32.xlu0 %v5150_v9, %s4942_s24 }
 0x6a5   : > { %3052 = vrot.lane.b32.xlu0 %v5154_v12, %s4941_s20 }
 0x6a9   : > { %3050 = vrot.lane.b32.xlu0 %v5154_v12, %s4942_s24 }
 0x70f   : > { %v2530_v52 = vpop.xlane.xlu1 %2529 }
 0x710   : > { %v2538_v53 = vsub.f32 %v2522_v34, %v2530_v52  ;;  %v2527_v54 = vpop.xlane.xlu0 %2526 }
 0x711   : > { %v2537_v55 = vsub.f32 %v2521_v37, %v2527_v54 }
 0x712   : > { %v2543_v56 = vmul.f32 1.442695, %v2538_v53 }
 0x713   : > { %v2541_v57 = vmul.f32 1.442695, %v2537_v55  ;;  %v2973_v20 = vpop.permute.xlu1 %2972 }
 0x714   : > { %4801 = vpow2.f32 %v2543_v56  ;;  %v2536_v58 = vpop.xlane.xlu0 %2535 }
 0x715   : > { %4803 = vpow2.f32 %v2541_v57  ;;  %v2540_v60 = vsub.f32 %v2524_v44, %v2536_v58 }
 0x717   : > { %v2547_v2 = vmul.f32 1.442695, %v2540_v60  ;;  %v3131_v28 = vpop.permute.xlu1 %3130 }
 0x718   : > { %v2533_v5 = vpop.xlane.xlu0 %2532 }
 0x719   : > { %4805 = vpow2.f32 %v2547_v2  ;;  %v2539_v8 = vsub.f32 %v2523_v46, %v2533_v5  ;;  %v1863_v2 = vsel %vm848_vm3, %v5312_v62, 0.0  ;;  %v1869_v5 = vsel %vm848_vm3, %v5323_v1, 0.0 }
 0x71b   : > { %v2545_v10 = vmul.f32 1.442695, %v2539_v8  ;;  %v3129_v30 = vpop.permute.xlu1 %3128 }
 0x71c   : > { %v2895_v25 = vpop.permute.xlu0 %2894 }
 0x71d   : > { %4807 = vpow2.f32 %v2545_v10 }
 0x71e   : > { %v5386_v15 = vpop.eup %4801 }
 0x71f   : > { %v5388_v16 = vpop.eup %4803  ;;  %4555 = vmatmul.mubr.msk.f32.vlgmr.msra.gmra.mrb[24].mxu0 %vm848_vm3, %v5386_v15 }
 0x720   : > { %4563 = vmatpush3.msra.mxu0 %v2790_v49  ;;  %4550 = vmatmul.mubr.msk.f32.vlgmr.msra.gmra.mrb[20].mxu1 %vm848_vm3, %v5388_v16  ;;  %v3053_v29 = vpop.permute.xlu0 %3052 }
 0x721   : > { %4558 = vmatpush3.msra.mxu1 %v2714_v48  ;;  %4564 = vmatprep.mubr.msk.f32.mxu0 %vm4932_vm2, %v4931_v4 }
 0x722   : > { %4572 = vmatprep.subr.mxu0 %v4931_v4  ;;  %4559 = vmatprep.mubr.msk.f32.mxu1 %vm4932_vm2, %v4931_v4 }
 0x723   : > { %v5399_v22 = vpop.eup %4805  ;;  %4567 = vmatprep.subr.mxu1 %v4931_v4 }
 0x724   : > { %4565 = vmatmul.mubr.msk.f32.vlgmr.msra.gmra.mrb[26].mxu0 %vm848_vm3, %v5399_v22  ;;  %v3051_v31 = vpop.permute.xlu0 %3050 }
 0x725   : > { %4574 = vmatprep.mubr.msk.f32.mxu0 %vm4932_vm2, %v4931_v4 }
 0x727   : > { %v5406_v27 = vpop.eup %4807  ;;  %4573 = vmatpush3.xpose.msk.msra.mxu0 %vm848_vm3, %v2975_v50 }
 0x728   : > { %4560 = vmatmul.mubr.msk.f32.vlgmr.msra.gmra.mrb[22].mxu1 %vm848_vm3, %v5406_v27  ;;  %4582 = vmatprep.subr.mxu0 %v4931_v4  ;;  %v2555_v59 = vsel %vm848_vm3, %v5406_v27, 0.0 }
 0x729   : > { %4568 = vmatpush3.xpose.msk.msra.mxu1 %vm848_vm3, %v2897_v51  ;;  %4569 = vmatprep.mubr.msk.f32.mxu1 %vm4932_vm2, %v4931_v4 }
 0x72a   : > { %4575 = vmatmul.mubr.msk.f32.vlgmr.msra.gmra.mrb[28].mxu0 %vm848_vm3, %v2973_v20  ;;  %4577 = vmatprep.subr.mxu1 %v4931_v4 }
 0x72b   : > { %4583 = vmatpush3.xpose.msk.msra.mxu0 %vm848_vm3, %v3131_v28  ;;  %4584 = vmatprep.mubr.msk.f32.mxu0 %vm4932_vm2, %v4931_v4 }
 0x72c   : > { %4570 = vmatmul.mubr.msk.f32.vlgmr.msra.gmra.mrb[24].mxu1 %vm848_vm3, %v2895_v25  ;;  %4592 = vmatprep.subr.mxu0 %v4931_v4 }
 0x72d   : > { %4578 = vmatpush3.xpose.msk.msra.mxu1 %vm848_vm3, %v3053_v29  ;;  %4579 = vmatprep.mubr.msk.f32.mxu1 %vm4932_vm2, %v4931_v4 }
 0x72e   : > { %4585 = vmatmul.mubr.msk.f32.vlgmr.msra.gmra.mrb[30].mxu0 %vm848_vm3, %v3129_v30  ;;  %4587 = vmatprep.subr.mxu1 %v4931_v4 }
 0x72f   : > { %4594 = vmatprep.mubr.msk.f32.mxu0 %vm4932_vm2, %v4931_v4 }
 0x730   : > { %4580 = vmatmul.mubr.msk.f32.vlgmr.msra.gmra.mrb[26].mxu1 %vm848_vm3, %v3051_v31 }
 0x731   : > { %4589 = vmatprep.mubr.msk.f32.mxu1 %vm4932_vm2, %v4931_v4 }
 0x7f2   : > { %v5432_v32 = vpop.f32.mrb[24].mxu0 }
 0x7f3   : > { %v4556_v33 = vpop.f32.mrb[25].mxu0  ;;  %v5434_v34 = vpop.f32.mrb[20].mxu1 }
 0x7f4   : > { %v4551_v35 = vpop.f32.mrb[21].mxu1 }
 0x7f7   : > { %v5436_v36 = vpop.f32.mrb[26].mxu0 }
 0x7f8   : > { %v4566_v37 = vpop.f32.mrb[27].mxu0 }
 0x7fb   : > { %v5438_v38 = vpop.f32.mrb[22].mxu1 }
 0x7fc   : > { %v4561_v39 = vpop.f32.mrb[23].mxu1 }
 0x7fd   : > { %v3046_v40 = vpop.f32.mrb[28].mxu0 }
 0x7fe   : > { %v3207_v41 = vmul.f32 0.35355338, %v3046_v40  ;;  %v4576_v42 = vpop.f32.mrb[29].mxu0 }
 0x7ff   : > { %v2968_v43 = vpop.f32.mrb[24].mxu1 }
 0x800   : > { %v3206_v44 = vmul.f32 0.35355338, %v2968_v43  ;;  %v3211_v45 = vsel %vm5192_vm4, %v3207_v41, -1e+30  ;;  %v4571_v46 = vpop.f32.mrb[25].mxu1 }
 0x801   : > { %v3202_v47 = vpop.f32.mrb[30].mxu0  ;;  %v3217_v48 = vsel %vm848_vm3, %v3211_v45, -inf  ;;  %v1197_v46 = vsel %vm848_vm3, %v5244_v3, 0.0 }
 0x802   : > { %v3209_v49 = vmul.f32 0.35355338, %v3202_v47  ;;  %3218 = vmax.xlane.f32.xlu1 %v3217_v48  ;;  %v4586_v50 = vpop.f32.mrb[31].mxu0  ;;  %v3210_v51 = vsel %vm5192_vm4, %v3206_v44, -1e+30  ;;  %v1191_v44 = vsel %vm848_vm3, %v5224_v61, 0.0 }
 0x803   : > { %v3124_v52 = vpop.f32.mrb[26].mxu1  ;;  %v3214_v53 = vsel %vm848_vm3, %v3210_v51, -inf  ;;  %v1194_v47 = vsel %vm848_vm3, %v5237_v0, 0.0 }
 0x804   : > { %v3208_v54 = vmul.f32 0.35355338, %v3124_v52  ;;  %3215 = vmax.xlane.f32.xlu0 %v3214_v53  ;;  %v4581_v55 = vpop.f32.mrb[27].mxu1  ;;  %v3213_v56 = vsel %vm5192_vm4, %v3209_v49, -1e+30 }
 0x805   : > { %v3223_v57 = vsel %vm848_vm3, %v3213_v56, -inf }
 0x806   : > { %v3212_v58 = vsel %vm5192_vm4, %v3208_v54, -1e+30 }
 0x807   : > { %v3220_v60 = vsel %vm848_vm3, %v3212_v58, -inf }
 0x808   : > { %3224 = vmax.xlane.f32.xlu0 %v3223_v57 }
 0x80c   : > { %3221 = vmax.xlane.f32.xlu0 %v3220_v60 }
 0x813   : > { %3326 = vrot.lane.b32.xlu1 %v5148_v7, %s4943_s14  ;;  %v2549_v7 = vsel %vm848_vm3, %v5388_v16, 0.0 }
 0x817   : > { %3402 = vrot.lane.b32.xlu1 %v5154_v12, %s4943_s14  ;;  %v2558_v12 = vsel %vm848_vm3, %v5399_v22, 0.0 }
 0x81b   : > { %3478 = vrot.lane.b32.xlu1 %v5158_v13, %s4943_s14  ;;  %v1866_v13 = vsel %vm848_vm3, %v5330_v6, 0.0 }
 0x822   : > { %3250 = vrot.lane.b32.xlu0 %v5150_v9, %s4943_s14  ;;  %v2552_v9 = vsel %vm848_vm3, %v5386_v15, 0.0 }
 0x83f   : > { %1864 = vadd.xlane.f32.xlu1 %v1863_v2 }
 0x841   : > { %1861 = vadd.xlane.f32.xlu0 %v1860_v24 }
 0x843   : > { %1870 = vadd.xlane.f32.xlu1 %v1869_v5 }
 0x845   : > { %2550 = vadd.xlane.f32.xlu0 %v2549_v7 }
 0x847   : > { %2559 = vadd.xlane.f32.xlu1 %v2558_v12 }
 0x849   : > { %2553 = vadd.xlane.f32.xlu0 %v2552_v9 }
 0x84d   : > { %1867 = vadd.xlane.f32.xlu0 %v1866_v13 }
 0x851   : > { %2556 = vadd.xlane.f32.xlu0 %v2555_v59 }
 0x88f   : > { %v3219_v62 = vpop.xlane.xlu1 %3218 }
 0x890   : > { %v3227_v1 = vsub.f32 %v3211_v45, %v3219_v62 }
 0x891   : > { %v3216_v8 = vpop.xlane.xlu0 %3215 }
 0x892   : > { %v3232_v10 = vmul.f32 1.442695, %v3227_v1  ;;  %v3226_v16 = vsub.f32 %v3210_v51, %v3216_v8 }
 0x893   : > { %v3327_v20 = vpop.permute.xlu1 %3326 }
 0x894   : > { %4809 = vpow2.f32 %v3232_v10  ;;  %v3230_v22 = vmul.f32 1.442695, %v3226_v16  ;;  %4593 = vmatpush3.msra.mxu0 %v3327_v20 }
 0x895   : > { %v3225_v25 = vpop.xlane.xlu0 %3224  ;;  %4602 = vmatprep.subr.mxu0 %v4931_v4 }
 0x896   : > { %4811 = vpow2.f32 %v3230_v22  ;;  %v3229_v15 = vsub.f32 %v3213_v56, %v3225_v25 }
 0x897   : > { %v3403_v28 = vpop.permute.xlu1 %3402 }
 0x898   : > { %v3236_v6 = vmul.f32 1.442695, %v3229_v15 }
 0x899   : > { %v3222_v29 = vpop.xlane.xlu0 %3221 }
 0x89a   : > { %4813 = vpow2.f32 %v3236_v6  ;;  %v3228_v27 = vsub.f32 %v3212_v58, %v3222_v29 }
 0x89b   : > { %v3479_v35 = vpop.permute.xlu1 %3478 }
 0x89c   : > { %v3234_v30 = vmul.f32 1.442695, %v3228_v27  ;;  %v3587_v27 = vld [vmem:[%s5682_s26] sm:$0xff] }
 0x89d   : > { %v3251_v31 = vpop.permute.xlu0 %3250 }
 0x89e   : > { %v4810_v33 = vpop.eup %4809  ;;  %4815 = vpow2.f32 %v3234_v30  ;;  %4588 = vmatpush3.msra.mxu1 %v3251_v31  ;;  %v3588_v30 = vld [vmem:[%s5682_s26 + $0x8] sm:$0xff] }
 0x89f   : > { %4595 = vmatmul.mubr.msk.f32.vlgmr.msra.gmra.mrb[32].mxu0 %vm848_vm3, %v4810_v33  ;;  %v3241_v37 = vsel %vm848_vm3, %v4810_v33, 0.0  ;;  %4597 = vmatprep.subr.mxu1 %v4931_v4  ;;  %v4681_v31 = vpack.c.bf16 %v3588_v30, %v3587_v27  ;;  %v3589_v33 = vld [vmem:[%s5682_s26 + $0x10] sm:$0xff] }
 0x8a0   : > { %v4812_v39 = vpop.eup %4811  ;;  %4603 = vmatpush3.msra.mxu0 %v3479_v35  ;;  %3242 = vadd.xlane.f32.xlu1 %v3241_v37  ;;  %v3590_v35 = vld [vmem:[%s5682_s26 + $0x18] sm:$0xff] }
 0x8a1   : > { %4590 = vmatmul.mubr.msk.f32.vlgmr.msra.gmra.mrb[28].mxu1 %vm848_vm3, %v4812_v39  ;;  %v3238_v40 = vsel %vm848_vm3, %v4812_v39, 0.0  ;;  %4604 = vmatprep.mubr.msk.f32.mxu0 %vm4932_vm2, %v4931_v4  ;;  %v4685_v37 = vpack.c.bf16 %v3590_v35, %v3589_v33 }
 0x8a2   : > { %4598 = vmatpush3.msra.mxu1 %v3403_v28  ;;  %3239 = vadd.xlane.f32.xlu0 %v3238_v40 }
 0x8a3   : > { %4599 = vmatprep.mubr.msk.f32.mxu1 %vm4932_vm2, %v4931_v4  ;;  %v1188_v4 = vsel %vm848_vm3, %v5226_v63, 0.0  ;;  %4682 = vmatprep.subr.bf16.mxu0 %v4681_v31 }
 0x8a4   : > { %v4814_v41 = vpop.eup %4813 }
 0x8a5   : > { %4605 = vmatmul.mubr.msk.f32.vlgmr.msra.gmra.mrb[34].mxu0 %vm848_vm3, %v4814_v41  ;;  %v3247_v42 = vsel %vm848_vm3, %v4814_v41, 0.0 }
 0x8a6   : > { %3248 = vadd.xlane.f32.xlu1 %v3247_v42  ;;  %4684 = vmatpush3.bf16.msra.mxu0 %v4681_v31 }
 0x8a7   : > { %4686 = vmatprep.subr.bf16.mxu0 %v4685_v37 }
 0x8a8   : > { %v4816_v43 = vpop.eup %4815 }
 0x8a9   : > { %4600 = vmatmul.mubr.msk.f32.vlgmr.msra.gmra.mrb[30].mxu1 %vm848_vm3, %v4816_v43  ;;  %v3244_v45 = vsel %vm848_vm3, %v4816_v43, 0.0 }
 0x8aa   : > { %1192 = vadd.xlane.f32.xlu1 %v1191_v44  ;;  %3245 = vadd.xlane.f32.xlu0 %v3244_v45 }
 0x8ab   : > { %4688 = vmatpush3.bf16.msra.mxu0 %v4685_v37 }
 0x8ae   : > { %1198 = vadd.xlane.f32.xlu1 %v1197_v46  ;;  %1189 = vadd.xlane.f32.xlu0 %v1188_v4 }
 0x8b2   : > { %1195 = vadd.xlane.f32.xlu0 %v1194_v47 }
 0x8cc   : > { %v1865_v48 = vpop.xlane.xlu1 %1864 }
 0x8cd   : > { %4817 = vrcp.f32 %v1865_v48 }
 0x8ce   : > { %v1862_v49 = vpop.xlane.xlu0 %1861 }
 0x8cf   : > { %4819 = vrcp.f32 %v1862_v49 }
 0x8d0   : > { %v1871_v50 = vpop.xlane.xlu1 %1870 }
 0x8d2   : > { %v2551_v61 = vpop.xlane.xlu0 %2550 }
 0x8d3   : > { %4821 = vrcp.f32 %v2551_v61 }
 0x8d4   : > { %v2560_v63 = vpop.xlane.xlu1 %2559 }
 0x8d6   : > { %v2554_v51 = vpop.xlane.xlu0 %2553 }
 0x8d7   : > { %v4818_v52 = vpop.eup %4817  ;;  %4823 = vrcp.f32 %v2554_v51 }
 0x8d8   : > { %v2181_v3 = vmul.f32 %v4818_v52, %v5360_v21  ;;  %4825 = vrcp.f32 %v1871_v50 }
 0x8d9   : > { %v4820_v53 = vpop.eup %4819 }
 0x8da   : > { %2190 = vrot.lane.b32.xlu1 %v2181_v3, %s4944_s28  ;;  %v1868_v0 = vpop.xlane.xlu0 %1867  ;;  %v2180_v54 = vmul.f32 %v4820_v53, %v5358_v18 }
 0x8db   : > { %4827 = vrcp.f32 %v1868_v0 }
 0x8dc   : > { %2188 = vrot.lane.b32.xlu0 %v2180_v54, %s4944_s28  ;;  %4829 = vrcp.f32 %v2560_v63 }
 0x8dd   : > { %v4822_v55 = vpop.eup %4821 }
 0x8de   : > { %v2557_v56 = vpop.xlane.xlu0 %2556  ;;  %v2869_v57 = vmul.f32 %v4822_v55, %v5434_v34 }
 0x8df   : > { %4831 = vrcp.f32 %v2557_v56 }
 0x8e0   : > { %2877 = vrot.lane.b32.xlu1 %v2869_v57, %s4945_s29 }
 0x8e1   : > { %v4824_v21 = vpop.eup %4823 }
 0x8e2   : > { %v2870_v58 = vmul.f32 %v4824_v21, %v5432_v32  ;;  %v4826_v60 = vpop.eup %4825 }
 0x8e3   : > { %v2183_v24 = vmul.f32 %v4826_v60, %v5362_v23  ;;  %v4873_v60 = vld [vmem:[#allocation2 + $0x8] sm:$0xff] }
 0x8e4   : > { %2879 = vrot.lane.b32.xlu1 %v2870_v58, %s4945_s29  ;;  %v4303_v58 = vld [vmem:[%s5683_s19] ss:$0 sm:$0xff] }
 0x8e5   : > { %v4828_v2 = vpop.eup %4827 }
 0x8e6   : > { %v2182_v18 = vmul.f32 %v4828_v2, %v5364_v26  ;;  %v4830_v5 = vpop.eup %4829 }
 0x8e7   : > { %v2872_v34 = vmul.f32 %v4830_v5, %v5436_v36 }
 0x8e8   : > { %2194 = vrot.lane.b32.xlu1 %v2183_v24, %s4944_s28  ;;  %2192 = vrot.lane.b32.xlu0 %v2182_v18, %s4944_s28  ;;  %v4874_v18 = vld [vmem:[#allocation2] sm:$0xff] }
 0x8e9   : > { %v4832_v7 = vpop.eup %4831 }
 0x8ea   : > { %v2871_v12 = vmul.f32 %v4832_v7, %v5438_v38 }
 0x8ec   : > { %2883 = vrot.lane.b32.xlu1 %v2872_v34, %s4945_s29  ;;  %2881 = vrot.lane.b32.xlu0 %v2871_v12, %s4945_s29 }
 0x92d   : > { %v3243_v32 = vpop.xlane.xlu1 %3242 }
 0x92f   : > { %v3240_v9 = vpop.xlane.xlu0 %3239 }
 0x933   : > { %v3249_v13 = vpop.xlane.xlu1 %3248 }
 0x937   : > { %v1193_v59 = vpop.xlane.xlu1 %1192  ;;  %v3246_v62 = vpop.xlane.xlu0 %3245 }
 0x938   : > { %4833 = vrcp.f32 %v1193_v59  ;;  %v4875_v59 = vld [vmem:[#allocation2 + $0x18] sm:$0xff] }
 0x93b   : > { %v1199_v23 = vpop.xlane.xlu1 %1198  ;;  %v1190_v26 = vpop.xlane.xlu0 %1189 }
 0x93c   : > { %4835 = vrcp.f32 %v1199_v23  ;;  %v4876_v23 = vld [vmem:[#allocation2 + $0x10] sm:$0xff] }
 0x93d   : > { %4837 = vrcp.f32 %v1190_v26 }
 0x93f   : > { %v1196_v1 = vpop.xlane.xlu0 %1195 }
 0x940   : > { %4839 = vrcp.f32 %v1196_v1 }
 0x941   : > { %4841 = vrcp.f32 %v3243_v32 }
 0x942   : > { %v4834_v8 = vpop.eup %4833  ;;  %4843 = vrcp.f32 %v3240_v9 }
 0x943   : > { %v1509_v10 = vmul.f32 %v4834_v8, %v5272_v11  ;;  %4845 = vrcp.f32 %v3249_v13 }
 0x944   : > { %4847 = vrcp.f32 %v3246_v62 }
 0x945   : > { %1513 = vst.msk [vmem:[#allocation3 + $0x8] sm:$0xff] %vm848_vm3, %v1509_v10 }
 0x946   : > { %v4836_v36 = vpop.eup %4835 }
 0x947   : > { %v4838_v38 = vpop.eup %4837  ;;  %v1511_v16 = vmul.f32 %v4836_v36, %v5278_v19 }
 0x948   : > { %v1508_v20 = vmul.f32 %v4838_v38, %v5274_v14 }
 0x949   : > { %1515 = vst.msk [vmem:[#allocation3 + $0x18] sm:$0xff] %vm848_vm3, %v1511_v16 }
 0x94a   : > { %v4840_v22 = vpop.eup %4839  ;;  %1512 = vst.msk [vmem:[#allocation3] sm:$0xff] %vm848_vm3, %v1508_v20 }
 0x94b   : > { %v1510_v25 = vmul.f32 %v4840_v22, %v5276_v17  ;;  %v4842_v39 = vpop.eup %4841 }
 0x94c   : > { %v2191_v15 = vpop.permute.xlu1 %2190  ;;  %v4844_v43 = vpop.eup %4843 }
 0x94d   : > { %2202 = vst.msk [vmem:[#allocation3 + $0x8] sm:$0xff] %vm2200_vm5, %v2191_v15  ;;  %v4846_v4 = vpop.eup %4845 }
 0x94e   : > { %1514 = vst.msk [vmem:[#allocation3 + $0x10] sm:$0xff] %vm848_vm3, %v1510_v25  ;;  %v2189_v11 = vpop.permute.xlu0 %2188  ;;  %v4848_v61 = vpop.eup %4847 }
 0x94f   : > { %2201 = vst.msk [vmem:[#allocation3] sm:$0xff] %vm2200_vm5, %v2189_v11 }
 0x952   : > { %v2878_v14 = vpop.permute.xlu1 %2877 }
 0x953   : > { %2890 = vst.msk [vmem:[#allocation3] sm:$0xff] %vm2889_vm6, %v2878_v14 }
 0x956   : > { %v2880_v19 = vpop.permute.xlu1 %2879 }
 0x957   : > { %2891 = vst.msk [vmem:[#allocation3 + $0x8] sm:$0xff] %vm2889_vm6, %v2880_v19 }
 0x95a   : > { %v2195_v6 = vpop.permute.xlu1 %2194  ;;  %v2193_v28 = vpop.permute.xlu0 %2192 }
 0x95b   : > { %2204 = vst.msk [vmem:[#allocation3 + $0x18] sm:$0xff] %vm2200_vm5, %v2195_v6  ;;  %2203 = vst.msk [vmem:[#allocation3 + $0x10] sm:$0xff] %vm2200_vm5, %v2193_v28 }
 0x95e   : > { %v2884_v17 = vpop.permute.xlu1 %2883  ;;  %v2882_v29 = vpop.permute.xlu0 %2881 }
 0x95f   : > { %2893 = vst.msk [vmem:[#allocation3 + $0x18] sm:$0xff] %vm2889_vm6, %v2884_v17  ;;  %2892 = vst.msk [vmem:[#allocation3 + $0x10] sm:$0xff] %vm2889_vm6, %v2882_v29 }
 0x972   : > { %v3398_v40 = vpop.f32.mrb[32].mxu0 }
 0x973   : > { %v3559_v41 = vmul.f32 %v4842_v39, %v3398_v40  ;;  %v4596_v42 = vpop.f32.mrb[33].mxu0  ;;  %v3777_v40 = vld [vmem:[%s5082_s3] sm:$0xff] }
 0x974   : > { %v3322_v44 = vpop.f32.mrb[28].mxu1 }
 0x975   : > { %3568 = vrot.lane.b32.xlu1 %v3559_v41, %s4946_s13  ;;  %v3558_v45 = vmul.f32 %v4844_v43, %v3322_v44  ;;  %v4591_v46 = vpop.f32.mrb[29].mxu1  ;;  %v3778_v41 = vld [vmem:[%s5082_s3 + $0x8] sm:$0xff]  ;;  %v3779_v43 = vld [vmem:[%s5082_s3 + $0x10] sm:$0xff]  ;;  %v3780_v44 = vld [vmem:[%s5082_s3 + $0x18] sm:$0xff] }
 0x976   : > { %v4689_v42 = vpack.c.bf16 %v3778_v41, %v3777_v40  ;;  %v4306_v40 = vld [vmem:[%s629_s5] ss:$0 sm:$0xff] }
 0x977   : > { %3566 = vrot.lane.b32.xlu0 %v3558_v45, %s4946_s13  ;;  %v4693_v45 = vpack.c.bf16 %v3780_v44, %v3779_v43 }
 0x978   : > { %v3550_v47 = vpop.f32.mrb[34].mxu0  ;;  %4690 = vmatprep.subr.bf16.mxu0 %v4689_v42 }
 0x979   : > { %v3561_v48 = vmul.f32 %v4846_v4, %v3550_v47  ;;  %v4606_v49 = vpop.f32.mrb[35].mxu0 }
 0x97b   : > { %3572 = vrot.lane.b32.xlu1 %v3561_v48, %s4946_s13 }
 0x97c   : > { %v3474_v50 = vpop.f32.mrb[30].mxu1 }
 0x97d   : > { %v3560_v51 = vmul.f32 %v4848_v61, %v3474_v50  ;;  %v4601_v52 = vpop.f32.mrb[31].mxu1 }
 0x97f   : > { %3570 = vrot.lane.b32.xlu0 %v3560_v51, %s4946_s13 }
 0x9e7   : > { %v3569_v3 = vpop.permute.xlu1 %3568 }
 0x9e8   : > { %3580 = vst.msk [vmem:[#allocation3 + $0x8] sm:$0xff] %vm3578_vm7, %v3569_v3 }
 0x9e9   : > { %v3567_v53 = vpop.permute.xlu0 %3566 }
 0x9ea   : > { %3579 = vst.msk [vmem:[#allocation3] sm:$0xff] %vm3578_vm7, %v3567_v53 }
 0x9ed   : > { %v3573_v63 = vpop.permute.xlu1 %3572 }
 0x9ee   : > { %3582 = vst.msk [vmem:[#allocation3 + $0x18] sm:$0xff] %vm3578_vm7, %v3573_v63 }
 0x9ef   : > { %v3584_v55 = vld [vmem:[#allocation3 + $0x8] sm:$0xff] }
 0x9f1   : > { %v3571_v0 = vpop.permute.xlu0 %3570  ;;  %v3583_v54 = vld [vmem:[#allocation3] sm:$0xff] }
 0x9f2   : > { %3581 = vst.msk [vmem:[#allocation3 + $0x10] sm:$0xff] %vm3578_vm7, %v3571_v0  ;;  %4615 = vmatprep.mubr.msk.f32.mxu0 %vm658_vm1, %v3583_v54  ;;  %v4304_v0 = vld [vmem:[%s618_s27] ss:$0 sm:$0xff] }
 0x9f3   : > { %4616 = vmatmul.mubr.msk.f32.vlgmr.msra.gmra.mrb[36].mxu0 %vm658_vm1, %v3584_v55 }
 0x9f4   : > { %4692 = vmatpush3.bf16.msra.mxu0 %v4689_v42 }
 0x9f5   : > { %v3586_v57 = vld [vmem:[#allocation3 + $0x18] sm:$0xff]  ;;  %4694 = vmatprep.subr.bf16.mxu0 %v4693_v45 }
 0x9f8   : > { %4696 = vmatpush3.bf16.msra.mxu0 %v4693_v45 }
 0x9f9   : > { %v3585_v56 = vld [vmem:[#allocation3 + $0x10] sm:$0xff] }
 0x9fa   : > { %4618 = vmatprep.mubr.msk.f32.mxu0 %vm658_vm1, %v3585_v56 }
 0x9fb   : > { %4619 = vmatmul.mubr.msk.f32.gmra.mrb[38].mxu0 %vm658_vm1, %v3586_v57 }
 0xac6   : > { %v4617_v21 = vpop.f32.mrb[36].mxu0 }
 0xac7   : > { %v3689_v2 = vadd.f32 %v4873_v60, %v4617_v21  ;;  %v3669_v24 = vpop.f32.mrb[37].mxu0  ;;  %v4305_v21 = vld [vmem:[%s621_s23] ss:$0 sm:$0xff] }
 0xac8   : > { %v3688_v5 = vadd.f32 %v4874_v18, %v3669_v24 }
 0xac9   : > { %v5531_v7 = vadd.f32 %v4303_v58, %v3689_v2 }
 0xaca   : > { %v5533_v34 = vadd.f32 %v4303_v58, %v3688_v5 }
 0xacb   : > { %v3708_v12 = vsel %vm658_vm1, %v5531_v7, 0.0 }
 0xacc   : > { %3709 = vadd.xlane.f32.xlu1 %v3708_v12  ;;  %v3705_v32 = vsel %vm658_vm1, %v5533_v34, 0.0 }
 0xacd   : > { %3706 = vadd.xlane.f32.xlu0 %v3705_v32 }
 0xace   : > { %v4620_v9 = vpop.f32.mrb[38].mxu0 }
 0xacf   : > { %v3679_v13 = vpop.f32.mrb[39].mxu0  ;;  %v3691_v62 = vadd.f32 %v4875_v59, %v4620_v9 }
 0xad0   : > { %v3690_v26 = vadd.f32 %v4876_v23, %v3679_v13  ;;  %v3917_v23 = vld [vmem:[%s5092_s17] sm:$0xff] }
 0xad1   : > { %v5541_v8 = vadd.f32 %v4303_v58, %v3691_v62 }
 0xad2   : > { %v5539_v1 = vadd.f32 %v4303_v58, %v3690_v26  ;;  %v3918_v26 = vld [vmem:[%s5092_s17 + $0x8] sm:$0xff] }
 0xad3   : > { %v3714_v36 = vsel %vm658_vm1, %v5541_v8, 0.0 }
 0xad4   : > { %v3711_v10 = vsel %vm658_vm1, %v5539_v1, 0.0 }
 0xad5   : > { %3712 = vadd.xlane.f32.xlu0 %v3711_v10  ;;  %v4697_v10 = vpack.c.bf16 %v3918_v26, %v3917_v23 }
 0xad7   : > { %4698 = vmatprep.subr.bf16.mxu1 %v4697_v10 }
 0xad8   : > { %4700 = vmatpush3.bf16.msra.mxu1 %v4697_v10 }
 0xad9   : > { %3715 = vadd.xlane.f32.xlu0 %v3714_v36  ;;  %v3919_v36 = vld [vmem:[%s5092_s17 + $0x10] sm:$0xff] }
 0xb59   : > { %v3710_v38 = vpop.xlane.xlu1 %3709 }
 0xb5a   : > { %v3718_v16 = vmul.f32 0.03125, %v3710_v38  ;;  %v3707_v20 = vpop.xlane.xlu0 %3706  ;;  %v3920_v38 = vld [vmem:[%s5092_s17 + $0x18] sm:$0xff] }
 0xb5b   : > { %v3717_v22 = vmul.f32 0.03125, %v3707_v20  ;;  %v3921_v20 = vld [vmem:[%s5092_s17 + $0x20] sm:$0xff] }
 0xb5c   : > { %v3722_v25 = vsub.f32 %v5531_v7, %v3718_v16  ;;  %v4701_v16 = vpack.c.bf16 %v3920_v38, %v3919_v36 }
 0xb5d   : > { %v3721_v15 = vsub.f32 %v5533_v34, %v3717_v22  ;;  %v3922_v22 = vld [vmem:[%s5092_s17 + $0x28] sm:$0xff] }
 0xb5e   : > { %v3726_v11 = vmul.f32 %v3722_v25, %v3722_v25  ;;  %4702 = vmatprep.subr.bf16.mxu1 %v4701_v16 }
 0xb5f   : > { %v3725_v14 = vmul.f32 %v3721_v15, %v3721_v15  ;;  %4704 = vmatpush3.bf16.msra.mxu1 %v4701_v16 }
 0xb60   : > { %v3732_v19 = vsel %vm658_vm1, %v3726_v11, 0.0  ;;  %v3924_v11 = vld [vmem:[%s5092_s17 + $0x38] sm:$0xff] }
 0xb61   : > { %3733 = vadd.xlane.f32.xlu1 %v3732_v19  ;;  %v3729_v6 = vsel %vm658_vm1, %v3725_v14, 0.0  ;;  %v3925_v19 = vld [vmem:[%s5092_s17 + $0x40] sm:$0xff] }
 0xb62   : > { %3730 = vadd.xlane.f32.xlu0 %v3729_v6  ;;  %v3713_v28 = vpop.xlane.xlu0 %3712  ;;  %v3926_v6 = vld [vmem:[%s5092_s17 + $0x48] sm:$0xff] }
 0xb63   : > { %v3719_v17 = vmul.f32 0.03125, %v3713_v28  ;;  %v4713_v28 = vpack.c.bf16 %v3926_v6, %v3925_v19 }
 0xb65   : > { %v3723_v29 = vsub.f32 %v5539_v1, %v3719_v17  ;;  %v3927_v17 = vld [vmem:[%s5092_s17 + $0x50] sm:$0xff] }
 0xb66   : > { %v3716_v27 = vpop.xlane.xlu0 %3715 }
 0xb67   : > { %v3720_v30 = vmul.f32 0.03125, %v3716_v27  ;;  %v3727_v31 = vmul.f32 %v3723_v29, %v3723_v29 }
 0xb69   : > { %v3724_v33 = vsub.f32 %v5541_v8, %v3720_v30  ;;  %v3735_v35 = vsel %vm658_vm1, %v3727_v31, 0.0  ;;  %v3929_v30 = vld [vmem:[%s5092_s17 + $0x60] sm:$0xff]  ;;  %v3930_v31 = vld [vmem:[%s5092_s17 + $0x68] sm:$0xff] }
 0xb6a   : > { %3736 = vadd.xlane.f32.xlu0 %v3735_v35  ;;  %v3931_v35 = vld [vmem:[%s5092_s17 + $0x70] sm:$0xff] }
 0xb6b   : > { %v3728_v37 = vmul.f32 %v3724_v33, %v3724_v33 }
 0xb6d   : > { %v3738_v39 = vsel %vm658_vm1, %v3728_v37, 0.0  ;;  %v3932_v37 = vld [vmem:[%s5092_s17 + $0x78] sm:$0xff] }
 0xb6e   : > { %3739 = vadd.xlane.f32.xlu1 %v3738_v39  ;;  %v4725_v39 = vpack.c.bf16 %v3932_v37, %v3931_v35 }
 0xbee   : > { %v3734_v46 = vpop.xlane.xlu1 %3733 }
 0xbef   : > { %v3742_v4 = vmul.f32 0.03125, %v3734_v46  ;;  %v3731_v47 = vpop.xlane.xlu0 %3730 }
 0xbf0   : > { %v3741_v48 = vmul.f32 0.03125, %v3731_v47 }
 0xbf1   : > { %v3746_v49 = vadd.f32 1e-05, %v3742_v4 }
 0xbf2   : > { %v3745_v61 = vadd.f32 1e-05, %v3741_v48 }
 0xbf3   : > { %4849 = vrsqrt.f32 %v3746_v49 }
 0xbf4   : > { %4851 = vrsqrt.f32 %v3745_v61 }
 0xbf7   : > { %v3737_v50 = vpop.xlane.xlu0 %3736 }
 0xbf8   : > { %v3743_v51 = vmul.f32 0.03125, %v3737_v50 }
 0xbfa   : > { %v3747_v52 = vadd.f32 1e-05, %v3743_v51 }
 0xbfb   : > { %v3740_v3 = vpop.xlane.xlu1 %3739 }
 0xbfc   : > { %4853 = vrsqrt.f32 %v3747_v52  ;;  %v3744_v53 = vmul.f32 0.03125, %v3740_v3 }
 0xbfd   : > { %v4850_v63 = vpop.eup %4849 }
 0xbfe   : > { %v4852_v54 = vpop.eup %4851  ;;  %v3754_v55 = vmul.f32 %v4850_v63, %v3722_v25  ;;  %v3748_v56 = vadd.f32 1e-05, %v3744_v53  ;;  %v4705_v25 = vpack.c.bf16 %v3922_v22, %v3921_v20 }
 0xbff   : > { %v3753_v57 = vmul.f32 %v4852_v54, %v3721_v15  ;;  %v3923_v15 = vld [vmem:[%s5092_s17 + $0x30] sm:$0xff] }
 0xc00   : > { %4855 = vrsqrt.f32 %v3748_v56  ;;  %v3764_v58 = vmul.f32 %v4304_v0, %v3754_v55  ;;  %4706 = vmatprep.subr.bf16.mxu1 %v4705_v25  ;;  %v4709_v14 = vpack.c.bf16 %v3924_v11, %v3923_v15 }
 0xc01   : > { %v3763_v60 = vmul.f32 %v4304_v0, %v3753_v57  ;;  %4708 = vmatpush3.bf16.msra.mxu1 %v4705_v25 }
 0xc02   : > { %v3774_v24 = vadd.f32 %v4305_v21, %v3764_v58  ;;  %4710 = vmatprep.subr.bf16.mxu1 %v4709_v14 }
 0xc03   : > { %v3773_v2 = vadd.f32 %v4305_v21, %v3763_v60 }
 0xc05   : > { %4629 = vmatprep.mubr.msk.f32.mxu0 %vm658_vm1, %v3773_v2  ;;  %4712 = vmatpush3.bf16.msra.mxu1 %v4709_v14 }
 0xc06   : > { %v4854_v18 = vpop.eup %4853  ;;  %4630 = vmatmul.mubr.msk.f32.vlgmr.msra.gmra.mrb[40].mxu0 %vm658_vm1, %v3774_v24  ;;  %4714 = vmatprep.subr.bf16.mxu1 %v4713_v28 }
 0xc07   : > { %v3755_v5 = vmul.f32 %v4854_v18, %v3723_v29  ;;  %v3928_v29 = vld [vmem:[%s5092_s17 + $0x58] sm:$0xff] }
 0xc08   : > { %v4717_v27 = vpack.c.bf16 %v3928_v29, %v3927_v17 }
 0xc09   : > { %v3765_v12 = vmul.f32 %v4304_v0, %v3755_v5  ;;  %4716 = vmatpush3.bf16.msra.mxu1 %v4713_v28 }
 0xc0a   : > { %v4856_v32 = vpop.eup %4855  ;;  %4718 = vmatprep.subr.bf16.mxu1 %v4717_v27 }
 0xc0b   : > { %v3775_v9 = vadd.f32 %v4305_v21, %v3765_v12  ;;  %v3756_v13 = vmul.f32 %v4856_v32, %v3724_v33  ;;  %v4721_v33 = vpack.c.bf16 %v3930_v31, %v3929_v30 }
 0xc0d   : > { %4632 = vmatprep.mubr.msk.f32.mxu0 %vm658_vm1, %v3775_v9  ;;  %v3766_v59 = vmul.f32 %v4304_v0, %v3756_v13  ;;  %4720 = vmatpush3.bf16.msra.mxu1 %v4717_v27 }
 0xc0e   : > { %4722 = vmatprep.subr.bf16.mxu1 %v4721_v33 }
 0xc0f   : > { %v3776_v62 = vadd.f32 %v4305_v21, %v3766_v59  ;;  %v4315_v59 = vld [vmem:[%s637_s21] ss:$0 sm:$0xff] }
 0xc11   : > { %4633 = vmatmul.mubr.msk.f32.gmra.mrb[42].mxu0 %vm658_vm1, %v3776_v62  ;;  %4724 = vmatpush3.bf16.msra.mxu1 %v4721_v33 }
 0xc12   : > { %4726 = vmatprep.subr.bf16.mxu1 %v4725_v39 }
 0xc15   : > { %4728 = vmatpush3.bf16.msra.mxu1 %v4725_v39 }
 0xcd9   : > { %v4631_v41 = vpop.f32.mrb[40].mxu0 }
 0xcda   : > { %v3872_v42 = vadd.f32 %v4631_v41, %v4306_v40  ;;  %v3866_v43 = vpop.f32.mrb[41].mxu0 }
 0xcdb   : > { %v3867_v44 = vadd.f32 %v4306_v40, %v3866_v43 }
 0xcdc   : > { %v4312_v45 = vmul.f32 -1.702, %v3872_v42 }
 0xcdd   : > { %v4311_v46 = vmul.f32 -1.702, %v3867_v44 }
 0xcde   : > { %v3895_v4 = vmul.f32 1.442695, %v4312_v45 }
 0xcdf   : > { %v3893_v47 = vmul.f32 1.442695, %v4311_v46 }
 0xce0   : > { %4857 = vpow2.f32 %v3895_v4 }
 0xce1   : > { %4859 = vpow2.f32 %v3893_v47 }
 0xce4   : > { %v4634_v48 = vpop.f32.mrb[42].mxu0 }
 0xce5   : > { %v3882_v49 = vadd.f32 %v4634_v48, %v4306_v40  ;;  %v3876_v61 = vpop.f32.mrb[43].mxu0 }
 0xce6   : > { %v3877_v50 = vadd.f32 %v4306_v40, %v3876_v61 }
 0xce7   : > { %v4314_v51 = vmul.f32 -1.702, %v3882_v49 }
 0xce8   : > { %v4313_v52 = vmul.f32 -1.702, %v3877_v50 }
 0xce9   : > { %v3899_v3 = vmul.f32 1.442695, %v4314_v51 }
 0xcea   : > { %v4858_v53 = vpop.eup %4857  ;;  %v3897_v63 = vmul.f32 1.442695, %v4313_v52 }
 0xceb   : > { %v4860_v0 = vpop.eup %4859  ;;  %v3902_v54 = vadd.f32 1.0, %v4858_v53  ;;  %4861 = vpow2.f32 %v3899_v3 }
 0xcec   : > { %v3901_v55 = vadd.f32 1.0, %v4860_v0  ;;  %4863 = vpow2.f32 %v3897_v63 }
 0xced   : > { %4865 = vrcp.f32 %v3902_v54 }
 0xcee   : > { %4867 = vrcp.f32 %v3901_v55 }
 0xcf5   : > { %v4862_v56 = vpop.eup %4861 }
 0xcf6   : > { %v4864_v57 = vpop.eup %4863  ;;  %v3904_v21 = vadd.f32 1.0, %v4862_v56 }
 0xcf7   : > { %v4866_v58 = vpop.eup %4865  ;;  %v3903_v60 = vadd.f32 1.0, %v4864_v57 }
 0xcf8   : > { %v4868_v2 = vpop.eup %4867  ;;  %4869 = vrcp.f32 %v3904_v21  ;;  %v3914_v18 = vmul.f32 %v4866_v58, %v3872_v42 }
 0xcf9   : > { %v3913_v24 = vmul.f32 %v4868_v2, %v3867_v44  ;;  %4871 = vrcp.f32 %v3903_v60 }
 0xcfb   : > { %4667 = vmatprep.mubr.f32.mxu1 %v3913_v24 }
 0xcfc   : > { %4668 = vmatmul.mubr.f32.vlgmr.msra.gmra.mrb[32].mxu1 %v3914_v18 }
 0xd02   : > { %v4870_v5 = vpop.eup %4869 }
 0xd03   : > { %v4872_v12 = vpop.eup %4871  ;;  %v3916_v9 = vmul.f32 %v4870_v5, %v3882_v49 }
 0xd04   : > { %v3915_v32 = vmul.f32 %v4872_v12, %v3877_v50 }
 0xd06   : > { %4670 = vmatprep.mubr.f32.mxu1 %v3915_v32 }
 0xd07   : > { %4671 = vmatmul.mubr.f32.gmra.mrb[34].mxu1 %v3916_v9 }
 0xdcf   : > { %v4669_v13 = vpop.f32.mrb[32].mxu1 }
 0xdd0   : > { %v4019_v62 = vadd.f32 %v4669_v13, %v5531_v7  ;;  %v3999_v23 = vpop.f32.mrb[33].mxu1 }
 0xdd1   : > { %v4018_v26 = vadd.f32 %v3999_v23, %v5533_v34 }
 0xdd2   : > { %v4030_v10 = vadd.f32 %v4315_v59, %v4019_v62 }
 0xdd3   : > { %v4029_v36 = vadd.f32 %v4315_v59, %v4018_v26 }
 0xdd4   : > { %4034 = vst.msk [vmem:[#allocation2 + $0x8] sm:$0xff] %vm658_vm1, %v4030_v10  ;;  %4042 = vst.msk [vmem:[#allocation4 + $0x8] sm:$0xff] (!%p4316_p6), %vm658_vm1, %v4030_v10 }
 0xdd5   : > { %4033 = vst.msk [vmem:[#allocation2] sm:$0xff] %vm658_vm1, %v4029_v36  ;;  %4041 = vst.msk [vmem:[#allocation4] sm:$0xff] (!%p4316_p6), %vm658_vm1, %v4029_v36 }
 0xdda   : > { %v4672_v38 = vpop.f32.mrb[34].mxu1  ;;  %4040 = sbr.rel (%p4316_p6) target bundleno = 3553 (0xde1), region = 80 }
 0xddb   : > { %v4021_v16 = vadd.f32 %v4672_v38, %v5541_v8  ;;  %v4009_v20 = vpop.f32.mrb[35].mxu1 }
 0xddc   : > { %v4020_v22 = vadd.f32 %v4009_v20, %v5539_v1 }
 0xddd   : > { %v4032_v25 = vadd.f32 %v4315_v59, %v4021_v16 }
 0xdde   : > { %v4031_v15 = vadd.f32 %v4315_v59, %v4020_v22 }
 0xddf   : > { %4036 = vst.msk [vmem:[#allocation2 + $0x18] sm:$0xff] %vm658_vm1, %v4032_v25  ;;  %4044 = vst.msk [vmem:[#allocation4 + $0x18] sm:$0xff] (!%p4316_p6), %vm658_vm1, %v4032_v25 }
 0xde0   : > { %4035 = vst.msk [vmem:[#allocation2 + $0x10] sm:$0xff] %vm658_vm1, %v4031_v15  ;;  %4043 = vst.msk [vmem:[#allocation4 + $0x10] sm:$0xff] (!%p4316_p6), %vm658_vm1, %v4031_v15 }
 0xde1 PF: > { %s5684_s30 = sld [smem:[#allocation8_spill]]  ;;  %s4947_s14 = smov [#allocation4]  }
 0xde2   : > { %s4054_s29 = sshll.u32 %s4947_s14, 4  ;;  %s4055_s29 = int_to_ptr.vmem [resolvable:$true] %s4054_s29 }
 0xde3   : > { %s4877_s25 = scalar_lea.vmem %s4055_s29, 512  ;;  %p4884_p11 = scmp.lt.s32.totalorder %s4055_s29, %s4055_s29 }
 0xde4   : > { %p4878_p8 = scmp.ne.s32.totalorder %s4055_s29, %s4877_s25  ;;  %p4885_p12 = scmp.lt.s32.totalorder %s4877_s25, %s4877_s25 }
 0xde6   : > { %p4886_p13 = por %p4885_p12, %p4884_p11 }
 0xde7   : > { %s5685_s21 = sadd.s32 4294967295, %s5684_s30  }
 0xde8   : > { %p5614_p7 = scmp.eq.s32.totalorder %s5685_s21, 1 }
 0xdea   : > { %p4879_p9 = pnand %p4878_p8, %p5614_p7 }
 0xdec   : > { %p4880_p10 = pneg %p4879_p9 }
 0xdee   : > { %p4887_p0 = pnand %p4886_p13, %p4880_p10 }
 0xdf0   : > { %4890 = shalt.err (!%p4887_p0)
}
 0xdf1   : > { %s5687_s15 = sld [smem:[#allocation13_spill]] }
 0xdf7   : > { %s4891_s16 = scalar_lea.hbm %s5687_s15, 512 }
 0xdf8   : > { %p4892_p1 = scmp.ne.s32.totalorder %s5687_s15, %s4891_s16  ;;  %p4897_p4 = scmp.lt.u32.totalorder %s4891_s16, %s5687_s15 }
 0xdfa   : > { %p4893_p2 = pnand %p4892_p1, %p5614_p7 }
 0xdfc   : > { %p4894_p3 = pneg %p4893_p2 }
 0xdfe   : > { %p4899_p5 = pnand %p4897_p4, %p4894_p3 }
 0xe00   : > { %4902 = shalt.err (!%p4899_p5)
}
 0xe01   : > { %s4948_s20 = smov 128  }
 0xe02   : > { %4730 = dma.vmem_to_hbm [thread:$0]  (%p5614_p7), %s4055_s29, 512, %s5687_s15, [#allocation5], %s4948_s20, %s4948_s20, %s4944_s28  }
 0xe03   : > { %4916 = dma.done.wait (%p5614_p7), [#allocation5], 512  }
 0xe04   : > { %4918 = vsyncadd (%p5614_p7), [#allocation5], 4294966784 }
 0xe05 PF: > { %s5688_s5 = sld [smem:[#allocation8_spill]]  ;;  %s5689_s25 = sld [smem:[#allocation7_spill]] }
 0xe06   : > { %s5690_s26 = sld [smem:[#allocation9_spill]] }
 0xe0b   : > { %s24_s27 = sadd.s32 1, %s5688_s5  }
 0xe0c   : > { %p21_p6 = scmp.ge.s32.totalorder %s24_s27, 4  }
 0xe0e   :  { %23 = sbr.rel (!%p21_p6) target bundleno = 6 (0x6), region = 144 }
 0xe15   :  { %4070 = vsyncpa [#allocation5], 1 }
 0xe16   :  { %4072 = vsyncpa [#allocation5 + $0x1], 1 }

</bundles_post_ra>
